<compile_context>
chip_gen: v7x
topology: tpu7x:2x2x1
jax: 0.10.0
libtpu: 0.0.40
codegen_flags: <defaults>
</compile_context>

<pallas_src>
import functools

import jax
import jax.numpy as jnp
from jax.experimental import pallas as pl
from jax.experimental.pallas import tpu as pltpu

_BN_EPS = 1e-5
_LANE = 128
_MXU_DTYPE = jnp.bfloat16
_VMEM_LIMIT = 32 * 1024 * 1024       # safe on v5e/v6e/v7x; blocks are far smaller
_TILE_BYTES = 2 * 1024 * 1024        # per-block target for elementwise passes


# ----------------------------------------------------------------------------
# Small helpers
# ----------------------------------------------------------------------------
def _round_up(v, m):
    return -(-v // m) * m


def _largest_divisor(n, cap):
    cap = max(1, min(n, cap))
    for d in range(cap, 0, -1):
        if n % d == 0:
            return d
    return 1


def _pad_channels(x, target):
    pad = target - x.shape[-1]
    if pad == 0:
        return x
    cfg = [(0, 0)] * (x.ndim - 1) + [(0, pad)]
    return jnp.pad(x, cfg)


def _prep_weight(w_hwio, cin_p, cout_p):
    """(3,3,Cin,Cout) HWIO -> (9, Cin_p, Cout_p) bf16, tap-major, zero padded."""
    kh, kw, ci, co = w_hwio.shape
    w9 = w_hwio.astype(jnp.float32).reshape(kh * kw, ci, co)
    w9 = jnp.pad(w9, ((0, 0), (0, cin_p - ci), (0, cout_p - co)))
    return w9.astype(_MXU_DTYPE)


# ----------------------------------------------------------------------------
# Pallas kernels
# ----------------------------------------------------------------------------
def _conv3x3_bias_stats_kernel(x0_ref, x1_ref, x2_ref, w_ref, b_ref,
                               out_ref, sum_ref, sq_ref):
    """One output row of a 3x3 SAME conv as 9 accumulated MXU matmuls.

    x{0,1,2}_ref: (1, 1, W+2, Cin_p)   input rows for taps dh=0,1,2 (bf16)
    w_ref:        (9, Cin_p, Cout_p)   tap-major conv weights (bf16, resident)
    b_ref:        (1, Cout_p)          bias (f32)
    out_ref:      (1, 1, W, Cout_p)    conv+bias output row (f32)
    sum_ref/sq_ref: (1, 1, 1, Cout_p)  per-row partial BN statistics (f32)
    """
    wout = out_ref.shape[2]
    cp = out_ref.shape[3]
    acc = jnp.zeros((wout, cp), dtype=jnp.float32)
    rows = (x0_ref, x1_ref, x2_ref)
    for dh in range(3):
        row = rows[dh][0, 0]                       # (W+2, Cin_p) bf16
        for dw in range(3):
            acc = acc + jnp.dot(row[dw:dw + wout, :], w_ref[3 * dh + dw],
                                preferred_element_type=jnp.float32)
    acc = acc + b_ref[...]
    out_ref[0, 0] = acc
    sum_ref[0, 0] = jnp.sum(acc, axis=0, keepdims=True)
    sq_ref[0, 0] = jnp.sum(acc * acc, axis=0, keepdims=True)


def _bn_relu_kernel(x_ref, scale_ref, shift_ref, o_ref):
    """Tiled BN-apply + ReLU. x_ref: (TR, W, Cp) f32; scale/shift: (1, Cp)."""
    y = x_ref[...] * scale_ref[...] + shift_ref[...]
    o_ref[...] = jnp.maximum(y, 0.0).astype(o_ref.dtype)


def _bn_relu_pool_kernel(x_ref, scale_ref, shift_ref, act_ref, pool_ref):
    """BN-apply + ReLU with fused 2x2 maxpool.

    x_ref/act_ref: (RB, 2, W, Cp)  raw / activated conv2 row pairs (f32)
    pool_ref:      (RB, W//2, Cp)  pooled output (f32)
    """
    sc = scale_ref[...]
    sh = shift_ref[...]
    y = jnp.maximum(x_ref[...] * sc + sh, 0.0)
    act_ref[...] = y.astype(act_ref.dtype)

    wo = pool_ref.shape[1]

    def bnr(v):                                    # BN+ReLU on a window slice
        return jnp.maximum(v * sc + sh, 0.0)

    p00 = bnr(x_ref[:, 0:1, pl.ds(0, wo, 2), :])
    p01 = bnr(x_ref[:, 0:1, pl.ds(1, wo, 2), :])
    p10 = bnr(x_ref[:, 1:2, pl.ds(0, wo, 2), :])
    p11 = bnr(x_ref[:, 1:2, pl.ds(1, wo, 2), :])
    m = jnp.maximum(jnp.maximum(p00, p01), jnp.maximum(p10, p11))   # (RB,1,wo,Cp)
    pool_ref[...] = m[:, 0].astype(pool_ref.dtype)


def _maxpool2x2_kernel(x_ref, o_ref):
    """Standalone 2x2 pool (fallback for odd H/W). x_ref: (RB, 2, We, Cp)."""
    wo = o_ref.shape[1]
    p00 = x_ref[:, 0:1, pl.ds(0, wo, 2), :]
    p01 = x_ref[:, 0:1, pl.ds(1, wo, 2), :]
    p10 = x_ref[:, 1:2, pl.ds(0, wo, 2), :]
    p11 = x_ref[:, 1:2, pl.ds(1, wo, 2), :]
    m = jnp.maximum(jnp.maximum(p00, p01), jnp.maximum(p10, p11))
    o_ref[...] = m[:, 0]


# ----------------------------------------------------------------------------
# Pallas-call wrappers
# ----------------------------------------------------------------------------
def _conv3x3_pass(x_pad, w9, bias):
    """Tiled 3x3 conv + bias + partial BN stats. One output row per grid step."""
    n, hp2, wp2, cin_p = x_pad.shape
    h, w = hp2 - 2, wp2 - 2
    cout_p = w9.shape[-1]

    def row_spec(dh):
        return pl.BlockSpec((1, 1, wp2, cin_p),
                            lambda nn, hh, _dh=dh: (nn, hh + _dh, 0, 0))

    return pl.pallas_call(
        _conv3x3_bias_stats_kernel,
        grid=(n, h),
        in_specs=[
            row_spec(0), row_spec(1), row_spec(2),
            pl.BlockSpec((9, cin_p, cout_p), lambda nn, hh: (0, 0, 0)),
            pl.BlockSpec((1, cout_p), lambda nn, hh: (0, 0)),
        ],
        out_specs=(
            pl.BlockSpec((1, 1, w, cout_p), lambda nn, hh: (nn, hh, 0, 0)),
            pl.BlockSpec((1, 1, 1, cout_p), lambda nn, hh: (nn, hh, 0, 0)),
            pl.BlockSpec((1, 1, 1, cout_p), lambda nn, hh: (nn, hh, 0, 0)),
        ),
        out_shape=(
            jax.ShapeDtypeStruct((n, h, w, cout_p), jnp.float32),
            jax.ShapeDtypeStruct((n, h, 1, cout_p), jnp.float32),
            jax.ShapeDtypeStruct((n, h, 1, cout_p), jnp.float32),
        ),
        compiler_params=pltpu.CompilerParams(
            dimension_semantics=("parallel", "parallel"),
            vmem_limit_bytes=_VMEM_LIMIT),
    )(x_pad, x_pad, x_pad, w9, bias)


def _bn_scale_shift(sums, sqs, count, gamma_p, beta_p):
    """Tiny (per-channel) reduction of partial stats -> affine BN params."""
    s = jnp.sum(sums, axis=(0, 1, 2))
    q = jnp.sum(sqs, axis=(0, 1, 2))
    mean = s / count
    var = jnp.maximum(q / count - mean * mean, 0.0)       # biased batch var
    scale = gamma_p * jax.lax.rsqrt(var + _BN_EPS)
    shift = beta_p - mean * scale
    cp = scale.shape[0]
    return (scale.reshape(1, cp).astype(jnp.float32),
            shift.reshape(1, cp).astype(jnp.float32))


def _bn_relu_pass(conv_raw, scale, shift, out_dtype):
    n, h, w, cp = conv_raw.shape
    rows = n * h
    x3 = conv_raw.reshape(rows, w, cp)
    tr = _largest_divisor(rows, max(1, _TILE_BYTES // (w * cp * 4)))
    y = pl.pallas_call(
        _bn_relu_kernel,
        grid=(rows // tr,),
        in_specs=[pl.BlockSpec((tr, w, cp), lambda i: (i, 0, 0)),
                  pl.BlockSpec((1, cp), lambda i: (0, 0)),
                  pl.BlockSpec((1, cp), lambda i: (0, 0))],
        out_specs=pl.BlockSpec((tr, w, cp), lambda i: (i, 0, 0)),
        out_shape=jax.ShapeDtypeStruct((rows, w, cp), out_dtype),
        compiler_params=pltpu.CompilerParams(
            dimension_semantics=("parallel",), vmem_limit_bytes=_VMEM_LIMIT),
    )(x3, scale, shift)
    return y.reshape(n, h, w, cp)


def _bn_relu_pool_pass(conv_raw, scale, shift):
    """BN2-apply + ReLU + fused 2x2 maxpool (even H and W)."""
    n, h, w, cp = conv_raw.shape
    h2, w2 = h // 2, w // 2
    rows = n * h2
    x4 = conv_raw.reshape(rows, 2, w, cp)
    rb = _largest_divisor(rows, max(1, _TILE_BYTES // (2 * w * cp * 4)))
    act, pooled = pl.pallas_call(
        _bn_relu_pool_kernel,
        grid=(rows // rb,),
        in_specs=[pl.BlockSpec((rb, 2, w, cp), lambda i: (i, 0, 0, 0)),
                  pl.BlockSpec((1, cp), lambda i: (0, 0)),
                  pl.BlockSpec((1, cp), lambda i: (0, 0))],
        out_specs=(pl.BlockSpec((rb, 2, w, cp), lambda i: (i, 0, 0, 0)),
                   pl.BlockSpec((rb, w2, cp), lambda i: (i, 0, 0))),
        out_shape=(jax.ShapeDtypeStruct((rows, 2, w, cp), jnp.float32),
                   jax.ShapeDtypeStruct((rows, w2, cp), jnp.float32)),
        compiler_params=pltpu.CompilerParams(
            dimension_semantics=("parallel",), vmem_limit_bytes=_VMEM_LIMIT),
    )(x4, scale, shift)
    return act.reshape(n, h, w, cp), pooled.reshape(n, h2, w2, cp)


def _maxpool_pass(act):
    """Standalone ceil-mode pool on already-activated (zero-padded-even) data."""
    n, he, we, cp = act.shape
    h2, w2 = he // 2, we // 2
    rows = n * h2
    x4 = act.reshape(rows, 2, we, cp)
    rb = _largest_divisor(rows, max(1, _TILE_BYTES // (2 * we * cp * 4)))
    pooled = pl.pallas_call(
        _maxpool2x2_kernel,
        grid=(rows // rb,),
        in_specs=[pl.BlockSpec((rb, 2, we, cp), lambda i: (i, 0, 0, 0))],
        out_specs=pl.BlockSpec((rb, w2, cp), lambda i: (i, 0, 0)),
        out_shape=jax.ShapeDtypeStruct((rows, w2, cp), jnp.float32),
        compiler_params=pltpu.CompilerParams(
            dimension_semantics=("parallel",), vmem_limit_bytes=_VMEM_LIMIT),
    )(x4)
    return pooled.reshape(n, h2, w2, cp)


# ----------------------------------------------------------------------------
# Forward pass
# ----------------------------------------------------------------------------
def unet_encoder_block(x_nchw, params, max_pool=True):
    """Forward pass. Returns (output, conv_output), both NCHW like PyTorch."""
    x = jnp.transpose(x_nchw, (0, 2, 3, 1)).astype(jnp.float32)   # NCHW -> NHWC
    n, h, w, cin = x.shape
    cout = params["w1"].shape[-1]
    cin_p = _round_up(cin, _LANE)
    cout_p = _round_up(cout, _LANE)
    npix = n * h * w

    # ---- conv1 + bias (tiled, per-row partial BN stats) ----
    x_pad = jnp.pad(_pad_channels(x, cin_p),
                    ((0, 0), (1, 1), (1, 1), (0, 0))).astype(_MXU_DTYPE)
    w1 = _prep_weight(params["w1"], cin_p, cout_p)
    b1 = _pad_channels(params["b1"].astype(jnp.float32), cout_p).reshape(1, cout_p)
    raw1, s1, q1 = _conv3x3_pass(x_pad, w1, b1)
    scale1, shift1 = _bn_scale_shift(
        s1, q1, npix,
        _pad_channels(params["g1"].astype(jnp.float32), cout_p),
        _pad_channels(params["be1"].astype(jnp.float32), cout_p))

    # ---- BN1 apply + ReLU (tiled), bf16 activation feeds conv2's MXU ----
    a1 = _bn_relu_pass(raw1, scale1, shift1, _MXU_DTYPE)

    # ---- conv2 + bias ----
    a1_pad = jnp.pad(a1, ((0, 0), (1, 1), (1, 1), (0, 0)))
    w2 = _prep_weight(params["w2"], cout_p, cout_p)
    b2 = _pad_channels(params["b2"].astype(jnp.float32), cout_p).reshape(1, cout_p)
    raw2, s2, q2 = _conv3x3_pass(a1_pad, w2, b2)
    scale2, shift2 = _bn_scale_shift(
        s2, q2, npix,
        _pad_channels(params["g2"].astype(jnp.float32), cout_p),
        _pad_channels(params["be2"].astype(jnp.float32), cout_p))

    # ---- BN2 apply + ReLU (+ fused 2x2 ceil-mode maxpool on the fast path) ----
    if max_pool and h % 2 == 0 and w % 2 == 0:
        conv_p, pool_p = _bn_relu_pool_pass(raw2, scale2, shift2)
    else:
        conv_p = _bn_relu_pass(raw2, scale2, shift2, jnp.float32)
        if max_pool:
            # ceil_mode tail: post-ReLU values are >= 0, so zero padding is
            # equivalent to -inf padding for the max.
            ho, wo = -(-h // 2), -(-w // 2)
            padded = jnp.pad(conv_p,
                             ((0, 0), (0, 2 * ho - h), (0, 2 * wo - w), (0, 0)))
            pool_p = _maxpool_pass(padded)
        else:
            pool_p = conv_p

    conv_output = conv_p[..., :cout]
    out = pool_p[..., :cout]
    # NOTE: callers that can consume NHWC should skip these transposes; they are
    # kept only to match the PyTorch module's NCHW contract.
    return (jnp.transpose(out, (0, 3, 1, 2)),
            jnp.transpose(conv_output, (0, 3, 1, 2)))


# ----------------------------------------------------------------------------
# Pure-JAX f32 reference (sanity check only)
# ----------------------------------------------------------------------------
def _reference(x_nchw, params, max_pool=True):
    x = jnp.transpose(x_nchw, (0, 2, 3, 1)).astype(jnp.float32)

    def conv(v, w_hwio, b):
        y = jax.lax.conv_general_dilated(
            v, w_hwio, window_strides=(1, 1), padding="SAME",
            dimension_numbers=("NHWC", "HWIO", "NHWC"))
        return y + b.reshape(1, 1, 1, -1)

    def bn_relu(v, g, be):
        m = jnp.mean(v, axis=(0, 1, 2), keepdims=True)
        var = jnp.mean(jnp.square(v - m), axis=(0, 1, 2), keepdims=True)
        y = (v - m) * jax.lax.rsqrt(var + _BN_EPS)
        return jnp.maximum(y * g.reshape(1, 1, 1, -1) + be.reshape(1, 1, 1, -1), 0.0)

    a1 = bn_relu(conv(x, params["w1"], params["b1"]), params["g1"], params["be1"])
    a2 = bn_relu(conv(a1, params["w2"], params["b2"]), params["g2"], params["be2"])
    if max_pool:
        _, h, w, _ = a2.shape
        ho, wo = -(-h // 2), -(-w // 2)
        a2p = jnp.pad(a2, ((0, 0), (0, 2 * ho - h), (0, 2 * wo - w), (0, 0)),
                      constant_values=-jnp.inf)
        out = jax.lax.reduce_window(a2p, -jnp.inf, jax.lax.max,
                                    (1, 2, 2, 1), (1, 2, 2, 1), "VALID")
    else:
        out = a2
    return jnp.transpose(out, (0, 3, 1, 2)), jnp.transpose(a2, (0, 3, 1, 2))


# ----------------------------------------------------------------------------
# Main
# ----------------------------------------------------------------------------
if __name__ == "__main__":
    key = jax.random.PRNGKey(0)
    batch, cin, cout, hw = 2, 4, 8, 16

    k_x, k_w1, k_b1, k_g1, k_be1, k_w2, k_b2, k_g2, k_be2 = jax.random.split(key, 9)
    x = jax.random.normal(k_x, (batch, cin, hw, hw), dtype=jnp.float32)  # NCHW

    params = {
        # conv weights stored HWIO: (3, 3, Cin, Cout)
        "w1": 0.1 * jax.random.normal(k_w1, (3, 3, cin, cout), dtype=jnp.float32),
        "b1": 0.1 * jax.random.normal(k_b1, (cout,), dtype=jnp.float32),
        "g1": 1.0 + 0.1 * jax.random.normal(k_g1, (cout,), dtype=jnp.float32),
        "be1": 0.1 * jax.random.normal(k_be1, (cout,), dtype=jnp.float32),
        "w2": 0.1 * jax.random.normal(k_w2, (3, 3, cout, cout), dtype=jnp.float32),
        "b2": 0.1 * jax.random.normal(k_b2, (cout,), dtype=jnp.float32),
        "g2": 1.0 + 0.1 * jax.random.normal(k_g2, (cout,), dtype=jnp.float32),
        "be2": 0.1 * jax.random.normal(k_be2, (cout,), dtype=jnp.float32),
    }

    fwd = jax.jit(functools.partial(unet_encoder_block, max_pool=True))
    out, conv_out = fwd(x, params)
    out = jax.block_until_ready(out)
    conv_out = jax.block_until_ready(conv_out)

    assert out.shape == (batch, cout, hw // 2, hw // 2)
    assert conv_out.shape == (batch, cout, hw, hw)

    ref_out, ref_conv = _reference(x, params, max_pool=True)
    ref_out = jax.block_until_ready(ref_out)
    ref_conv = jax.block_until_ready(ref_conv)

    # Kernel uses bf16 MXU operands with f32 accumulation; reference is pure f32.
    assert jnp.allclose(conv_out, ref_conv, atol=5e-2, rtol=5e-2), float(
        jnp.max(jnp.abs(conv_out - ref_conv)))
    assert jnp.allclose(out, ref_out, atol=5e-2, rtol=5e-2), float(
        jnp.max(jnp.abs(out - ref_out)))

    print("KERNEL_OK")
</pallas_src>

<mosaic_0001>
module attributes {stable_mosaic.version = 11 : i64} {
  func.func @_conv3x3_bias_stats_kernel(%arg0: i32, %arg1: i32, %arg2: memref<1x1x18x128xbf16, #tpu.memory_space<vmem>>, %arg3: memref<1x1x18x128xbf16, #tpu.memory_space<vmem>>, %arg4: memref<1x1x18x128xbf16, #tpu.memory_space<vmem>>, %arg5: memref<9x128x128xbf16, #tpu.memory_space<vmem>>, %arg6: memref<1x128xf32, #tpu.memory_space<vmem>>, %arg7: memref<1x1x16x128xf32, #tpu.memory_space<vmem>>, %arg8: memref<1x1x1x128xf32, #tpu.memory_space<vmem>>, %arg9: memref<1x1x1x128xf32, #tpu.memory_space<vmem>>) attributes {dimension_semantics = [#tpu.dimension_semantics<parallel>, #tpu.dimension_semantics<parallel>], iteration_bounds = array<i64: 2, 16>, scalar_prefetch = 0 : i64, scratch_operands = 0 : i64, tpu.core_type = #tpu.core_type<tc>, window_params = [{transform_indices = @transform_0, window_bounds = array<i64: 1, 1, 18, 128>}, {transform_indices = @transform_1, window_bounds = array<i64: 1, 1, 18, 128>}, {transform_indices = @transform_2, window_bounds = array<i64: 1, 1, 18, 128>}, {pipeline_mode = #tpu.pipeline_mode<synchronous>, transform_indices = @transform_3, window_bounds = array<i64: 9, 128, 128>}, {pipeline_mode = #tpu.pipeline_mode<synchronous>, transform_indices = @transform_4, window_bounds = array<i64: 1, 128>}, {transform_indices = @transform_5, window_bounds = array<i64: 1, 1, 16, 128>}, {transform_indices = @transform_6, window_bounds = array<i64: 1, 1, 1, 128>}, {transform_indices = @transform_7, window_bounds = array<i64: 1, 1, 1, 128>}]} {
    %cst = arith.constant 0.000000e+00 : f32
    %0 = vector.broadcast %cst : f32 to vector<16x128xf32>
    %c0 = arith.constant 0 : index
    %c0_0 = arith.constant 0 : index
    %c0_1 = arith.constant 0 : index
    %c0_2 = arith.constant 0 : index
    %1 = vector.load %arg2[%c0, %c0_0, %c0_1, %c0_2] : memref<1x1x18x128xbf16, #tpu.memory_space<vmem>>, vector<1x1x18x128xbf16>
    %2 = vector.shape_cast %1 : vector<1x1x18x128xbf16> to vector<18x128xbf16>
    %3 = vector.extract_strided_slice %2 {offsets = [0, 0], sizes = [16, 128], strides = [1, 1]} : vector<18x128xbf16> to vector<16x128xbf16>
    %c0_3 = arith.constant 0 : index
    %c0_4 = arith.constant 0 : index
    %c0_5 = arith.constant 0 : index
    %4 = vector.load %arg5[%c0_3, %c0_4, %c0_5] : memref<9x128x128xbf16, #tpu.memory_space<vmem>>, vector<1x128x128xbf16>
    %5 = vector.shape_cast %4 : vector<1x128x128xbf16> to vector<128x128xbf16>
    %cst_6 = arith.constant dense<0.000000e+00> : vector<16x128xf32>
    %6 = tpu.matmul %3, %5, %cst_6 {dimension_numbers = #tpu.dot_dimension_numbers<[1], [0], [0], [1], [0, 0, 1, 1], [], []>} : vector<16x128xbf16>, vector<128x128xbf16>, vector<16x128xf32> -> vector<16x128xf32>
    %7 = arith.addf %0, %6 : vector<16x128xf32>
    %8 = vector.extract_strided_slice %2 {offsets = [1, 0], sizes = [16, 128], strides = [1, 1]} : vector<18x128xbf16> to vector<16x128xbf16>
    %c1 = arith.constant 1 : index
    %c0_7 = arith.constant 0 : index
    %c0_8 = arith.constant 0 : index
    %9 = vector.load %arg5[%c1, %c0_7, %c0_8] : memref<9x128x128xbf16, #tpu.memory_space<vmem>>, vector<1x128x128xbf16>
    %10 = vector.shape_cast %9 : vector<1x128x128xbf16> to vector<128x128xbf16>
    %cst_9 = arith.constant dense<0.000000e+00> : vector<16x128xf32>
    %11 = tpu.matmul %8, %10, %cst_9 {dimension_numbers = #tpu.dot_dimension_numbers<[1], [0], [0], [1], [0, 0, 1, 1], [], []>} : vector<16x128xbf16>, vector<128x128xbf16>, vector<16x128xf32> -> vector<16x128xf32>
    %12 = arith.addf %7, %11 : vector<16x128xf32>
    %13 = vector.extract_strided_slice %2 {offsets = [2, 0], sizes = [16, 128], strides = [1, 1]} : vector<18x128xbf16> to vector<16x128xbf16>
    %c2 = arith.constant 2 : index
    %c0_10 = arith.constant 0 : index
    %c0_11 = arith.constant 0 : index
    %14 = vector.load %arg5[%c2, %c0_10, %c0_11] : memref<9x128x128xbf16, #tpu.memory_space<vmem>>, vector<1x128x128xbf16>
    %15 = vector.shape_cast %14 : vector<1x128x128xbf16> to vector<128x128xbf16>
    %cst_12 = arith.constant dense<0.000000e+00> : vector<16x128xf32>
    %16 = tpu.matmul %13, %15, %cst_12 {dimension_numbers = #tpu.dot_dimension_numbers<[1], [0], [0], [1], [0, 0, 1, 1], [], []>} : vector<16x128xbf16>, vector<128x128xbf16>, vector<16x128xf32> -> vector<16x128xf32>
    %17 = arith.addf %12, %16 : vector<16x128xf32>
    %c0_13 = arith.constant 0 : index
    %c0_14 = arith.constant 0 : index
    %c0_15 = arith.constant 0 : index
    %c0_16 = arith.constant 0 : index
    %18 = vector.load %arg3[%c0_13, %c0_14, %c0_15, %c0_16] : memref<1x1x18x128xbf16, #tpu.memory_space<vmem>>, vector<1x1x18x128xbf16>
    %19 = vector.shape_cast %18 : vector<1x1x18x128xbf16> to vector<18x128xbf16>
    %20 = vector.extract_strided_slice %19 {offsets = [0, 0], sizes = [16, 128], strides = [1, 1]} : vector<18x128xbf16> to vector<16x128xbf16>
    %c3 = arith.constant 3 : index
    %c0_17 = arith.constant 0 : index
    %c0_18 = arith.constant 0 : index
    %21 = vector.load %arg5[%c3, %c0_17, %c0_18] : memref<9x128x128xbf16, #tpu.memory_space<vmem>>, vector<1x128x128xbf16>
    %22 = vector.shape_cast %21 : vector<1x128x128xbf16> to vector<128x128xbf16>
    %cst_19 = arith.constant dense<0.000000e+00> : vector<16x128xf32>
    %23 = tpu.matmul %20, %22, %cst_19 {dimension_numbers = #tpu.dot_dimension_numbers<[1], [0], [0], [1], [0, 0, 1, 1], [], []>} : vector<16x128xbf16>, vector<128x128xbf16>, vector<16x128xf32> -> vector<16x128xf32>
    %24 = arith.addf %17, %23 : vector<16x128xf32>
    %25 = vector.extract_strided_slice %19 {offsets = [1, 0], sizes = [16, 128], strides = [1, 1]} : vector<18x128xbf16> to vector<16x128xbf16>
    %c4 = arith.constant 4 : index
    %c0_20 = arith.constant 0 : index
    %c0_21 = arith.constant 0 : index
    %26 = vector.load %arg5[%c4, %c0_20, %c0_21] : memref<9x128x128xbf16, #tpu.memory_space<vmem>>, vector<1x128x128xbf16>
    %27 = vector.shape_cast %26 : vector<1x128x128xbf16> to vector<128x128xbf16>
    %cst_22 = arith.constant dense<0.000000e+00> : vector<16x128xf32>
    %28 = tpu.matmul %25, %27, %cst_22 {dimension_numbers = #tpu.dot_dimension_numbers<[1], [0], [0], [1], [0, 0, 1, 1], [], []>} : vector<16x128xbf16>, vector<128x128xbf16>, vector<16x128xf32> -> vector<16x128xf32>
    %29 = arith.addf %24, %28 : vector<16x128xf32>
    %30 = vector.extract_strided_slice %19 {offsets = [2, 0], sizes = [16, 128], strides = [1, 1]} : vector<18x128xbf16> to vector<16x128xbf16>
    %c5 = arith.constant 5 : index
    %c0_23 = arith.constant 0 : index
    %c0_24 = arith.constant 0 : index
    %31 = vector.load %arg5[%c5, %c0_23, %c0_24] : memref<9x128x128xbf16, #tpu.memory_space<vmem>>, vector<1x128x128xbf16>
    %32 = vector.shape_cast %31 : vector<1x128x128xbf16> to vector<128x128xbf16>
    %cst_25 = arith.constant dense<0.000000e+00> : vector<16x128xf32>
    %33 = tpu.matmul %30, %32, %cst_25 {dimension_numbers = #tpu.dot_dimension_numbers<[1], [0], [0], [1], [0, 0, 1, 1], [], []>} : vector<16x128xbf16>, vector<128x128xbf16>, vector<16x128xf32> -> vector<16x128xf32>
    %34 = arith.addf %29, %33 : vector<16x128xf32>
    %c0_26 = arith.constant 0 : index
    %c0_27 = arith.constant 0 : index
    %c0_28 = arith.constant 0 : index
    %c0_29 = arith.constant 0 : index
    %35 = vector.load %arg4[%c0_26, %c0_27, %c0_28, %c0_29] : memref<1x1x18x128xbf16, #tpu.memory_space<vmem>>, vector<1x1x18x128xbf16>
    %36 = vector.shape_cast %35 : vector<1x1x18x128xbf16> to vector<18x128xbf16>
    %37 = vector.extract_strided_slice %36 {offsets = [0, 0], sizes = [16, 128], strides = [1, 1]} : vector<18x128xbf16> to vector<16x128xbf16>
    %c6 = arith.constant 6 : index
    %c0_30 = arith.constant 0 : index
    %c0_31 = arith.constant 0 : index
    %38 = vector.load %arg5[%c6, %c0_30, %c0_31] : memref<9x128x128xbf16, #tpu.memory_space<vmem>>, vector<1x128x128xbf16>
    %39 = vector.shape_cast %38 : vector<1x128x128xbf16> to vector<128x128xbf16>
    %cst_32 = arith.constant dense<0.000000e+00> : vector<16x128xf32>
    %40 = tpu.matmul %37, %39, %cst_32 {dimension_numbers = #tpu.dot_dimension_numbers<[1], [0], [0], [1], [0, 0, 1, 1], [], []>} : vector<16x128xbf16>, vector<128x128xbf16>, vector<16x128xf32> -> vector<16x128xf32>
    %41 = arith.addf %34, %40 : vector<16x128xf32>
    %42 = vector.extract_strided_slice %36 {offsets = [1, 0], sizes = [16, 128], strides = [1, 1]} : vector<18x128xbf16> to vector<16x128xbf16>
    %c7 = arith.constant 7 : index
    %c0_33 = arith.constant 0 : index
    %c0_34 = arith.constant 0 : index
    %43 = vector.load %arg5[%c7, %c0_33, %c0_34] : memref<9x128x128xbf16, #tpu.memory_space<vmem>>, vector<1x128x128xbf16>
    %44 = vector.shape_cast %43 : vector<1x128x128xbf16> to vector<128x128xbf16>
    %cst_35 = arith.constant dense<0.000000e+00> : vector<16x128xf32>
    %45 = tpu.matmul %42, %44, %cst_35 {dimension_numbers = #tpu.dot_dimension_numbers<[1], [0], [0], [1], [0, 0, 1, 1], [], []>} : vector<16x128xbf16>, vector<128x128xbf16>, vector<16x128xf32> -> vector<16x128xf32>
    %46 = arith.addf %41, %45 : vector<16x128xf32>
    %47 = vector.extract_strided_slice %36 {offsets = [2, 0], sizes = [16, 128], strides = [1, 1]} : vector<18x128xbf16> to vector<16x128xbf16>
    %c8 = arith.constant 8 : index
    %c0_36 = arith.constant 0 : index
    %c0_37 = arith.constant 0 : index
    %48 = vector.load %arg5[%c8, %c0_36, %c0_37] : memref<9x128x128xbf16, #tpu.memory_space<vmem>>, vector<1x128x128xbf16>
    %49 = vector.shape_cast %48 : vector<1x128x128xbf16> to vector<128x128xbf16>
    %cst_38 = arith.constant dense<0.000000e+00> : vector<16x128xf32>
    %50 = tpu.matmul %47, %49, %cst_38 {dimension_numbers = #tpu.dot_dimension_numbers<[1], [0], [0], [1], [0, 0, 1, 1], [], []>} : vector<16x128xbf16>, vector<128x128xbf16>, vector<16x128xf32> -> vector<16x128xf32>
    %51 = arith.addf %46, %50 : vector<16x128xf32>
    %c0_39 = arith.constant 0 : index
    %c0_40 = arith.constant 0 : index
    %52 = vector.load %arg6[%c0_39, %c0_40] : memref<1x128xf32, #tpu.memory_space<vmem>>, vector<1x128xf32>
    %53 = vector.broadcast %52 : vector<1x128xf32> to vector<16x128xf32>
    %54 = arith.addf %51, %53 : vector<16x128xf32>
    %c0_41 = arith.constant 0 : index
    %c0_42 = arith.constant 0 : index
    %c0_43 = arith.constant 0 : index
    %c0_44 = arith.constant 0 : index
    %55 = vector.load %arg7[%c0_41, %c0_42, %c0_43, %c0_44] : memref<1x1x16x128xf32, #tpu.memory_space<vmem>>, vector<1x1x16x128xf32>
    %56 = vector.shape_cast %55 : vector<1x1x16x128xf32> to vector<16x128xf32>
    %57 = vector.shape_cast %54 : vector<16x128xf32> to vector<1x1x16x128xf32>
    tpu.vector_store %arg7[%c0_41, %c0_42, %c0_43, %c0_44], %57 {strides = array<i32>} : memref<1x1x16x128xf32, #tpu.memory_space<vmem>>, vector<1x1x16x128xf32>,
    %cst_45 = arith.constant dense<0.000000e+00> : vector<128xf32>
    %58 = vector.multi_reduction <add>, %54, %cst_45 [0] : vector<16x128xf32> to vector<128xf32>
    %59 = vector.shape_cast %58 : vector<128xf32> to vector<1x128xf32>
    %c0_46 = arith.constant 0 : index
    %c0_47 = arith.constant 0 : index
    %c0_48 = arith.constant 0 : index
    %c0_49 = arith.constant 0 : index
    %60 = vector.load %arg8[%c0_46, %c0_47, %c0_48, %c0_49] : memref<1x1x1x128xf32, #tpu.memory_space<vmem>>, vector<1x1x1x128xf32>
    %61 = vector.shape_cast %60 : vector<1x1x1x128xf32> to vector<1x128xf32>
    %62 = vector.shape_cast %59 : vector<1x128xf32> to vector<1x1x1x128xf32>
    tpu.vector_store %arg8[%c0_46, %c0_47, %c0_48, %c0_49], %62 {strides = array<i32>} : memref<1x1x1x128xf32, #tpu.memory_space<vmem>>, vector<1x1x1x128xf32>,
    %63 = arith.mulf %54, %54 : vector<16x128xf32>
    %cst_50 = arith.constant dense<0.000000e+00> : vector<128xf32>
    %64 = vector.multi_reduction <add>, %63, %cst_50 [0] : vector<16x128xf32> to vector<128xf32>
    %65 = vector.shape_cast %64 : vector<128xf32> to vector<1x128xf32>
    %c0_51 = arith.constant 0 : index
    %c0_52 = arith.constant 0 : index
    %c0_53 = arith.constant 0 : index
    %c0_54 = arith.constant 0 : index
    %66 = vector.load %arg9[%c0_51, %c0_52, %c0_53, %c0_54] : memref<1x1x1x128xf32, #tpu.memory_space<vmem>>, vector<1x1x1x128xf32>
    %67 = vector.shape_cast %66 : vector<1x1x1x128xf32> to vector<1x128xf32>
    %68 = vector.shape_cast %65 : vector<1x128xf32> to vector<1x1x1x128xf32>
    tpu.vector_store %arg9[%c0_51, %c0_52, %c0_53, %c0_54], %68 {strides = array<i32>} : memref<1x1x1x128xf32, #tpu.memory_space<vmem>>, vector<1x1x1x128xf32>,
    return
  }
  func.func @transform_0(%arg0: i32, %arg1: i32) -> (i32, i32, i32, i32) {
    %c0_i32 = arith.constant 0 : i32
    %0 = arith.addi %arg1, %c0_i32 : i32
    %c0_i32_0 = arith.constant 0 : i32
    %c0_i32_1 = arith.constant 0 : i32
    %c0_i32_2 = arith.constant 0 : i32
    return %arg0, %0, %c0_i32_0, %c0_i32_1 : i32, i32, i32, i32
  }
  func.func @transform_1(%arg0: i32, %arg1: i32) -> (i32, i32, i32, i32) {
    %c1_i32 = arith.constant 1 : i32
    %0 = arith.addi %arg1, %c1_i32 : i32
    %c0_i32 = arith.constant 0 : i32
    %c0_i32_0 = arith.constant 0 : i32
    %c0_i32_1 = arith.constant 0 : i32
    return %arg0, %0, %c0_i32, %c0_i32_0 : i32, i32, i32, i32
  }
  func.func @transform_2(%arg0: i32, %arg1: i32) -> (i32, i32, i32, i32) {
    %c2_i32 = arith.constant 2 : i32
    %0 = arith.addi %arg1, %c2_i32 : i32
    %c0_i32 = arith.constant 0 : i32
    %c0_i32_0 = arith.constant 0 : i32
    %c0_i32_1 = arith.constant 0 : i32
    return %arg0, %0, %c0_i32, %c0_i32_0 : i32, i32, i32, i32
  }
  func.func @transform_3(%arg0: i32, %arg1: i32) -> (i32, i32, i32) {
    %c0_i32 = arith.constant 0 : i32
    %c0_i32_0 = arith.constant 0 : i32
    %c0_i32_1 = arith.constant 0 : i32
    %c0_i32_2 = arith.constant 0 : i32
    return %c0_i32, %c0_i32_0, %c0_i32_1 : i32, i32, i32
  }
  func.func @transform_4(%arg0: i32, %arg1: i32) -> (i32, i32) {
    %c0_i32 = arith.constant 0 : i32
    %c0_i32_0 = arith.constant 0 : i32
    %c0_i32_1 = arith.constant 0 : i32
    return %c0_i32, %c0_i32_0 : i32, i32
  }
  func.func @transform_5(%arg0: i32, %arg1: i32) -> (i32, i32, i32, i32) {
    %c0_i32 = arith.constant 0 : i32
    %c0_i32_0 = arith.constant 0 : i32
    %c0_i32_1 = arith.constant 0 : i32
    return %arg0, %arg1, %c0_i32, %c0_i32_0 : i32, i32, i32, i32
  }
  func.func @transform_6(%arg0: i32, %arg1: i32) -> (i32, i32, i32, i32) {
    %c0_i32 = arith.constant 0 : i32
    %c0_i32_0 = arith.constant 0 : i32
    %c0_i32_1 = arith.constant 0 : i32
    return %arg0, %arg1, %c0_i32, %c0_i32_0 : i32, i32, i32, i32
  }
  func.func @transform_7(%arg0: i32, %arg1: i32) -> (i32, i32, i32, i32) {
    %c0_i32 = arith.constant 0 : i32
    %c0_i32_0 = arith.constant 0 : i32
    %c0_i32_1 = arith.constant 0 : i32
    return %arg0, %arg1, %c0_i32, %c0_i32_0 : i32, i32, i32, i32
  }
}

module attributes {stable_mosaic.version = 11 : i64} {
  func.func @_bn_relu_kernel(%arg0: i32, %arg1: memref<32x16x128xf32, #tpu.memory_space<vmem>>, %arg2: memref<1x128xf32, #tpu.memory_space<vmem>>, %arg3: memref<1x128xf32, #tpu.memory_space<vmem>>, %arg4: memref<32x16x128xbf16, #tpu.memory_space<vmem>>) attributes {dimension_semantics = [#tpu.dimension_semantics<parallel>], iteration_bounds = array<i64: 1>, scalar_prefetch = 0 : i64, scratch_operands = 0 : i64, tpu.core_type = #tpu.core_type<tc>, window_params = [{transform_indices = @transform_0, window_bounds = array<i64: 32, 16, 128>}, {pipeline_mode = #tpu.pipeline_mode<synchronous>, transform_indices = @transform_1, window_bounds = array<i64: 1, 128>}, {pipeline_mode = #tpu.pipeline_mode<synchronous>, transform_indices = @transform_2, window_bounds = array<i64: 1, 128>}, {transform_indices = @transform_3, window_bounds = array<i64: 32, 16, 128>}]} {
    %c0 = arith.constant 0 : index
    %c0_0 = arith.constant 0 : index
    %c0_1 = arith.constant 0 : index
    %0 = vector.load %arg1[%c0, %c0_0, %c0_1] : memref<32x16x128xf32, #tpu.memory_space<vmem>>, vector<32x16x128xf32>
    %c0_2 = arith.constant 0 : index
    %c0_3 = arith.constant 0 : index
    %1 = vector.load %arg2[%c0_2, %c0_3] : memref<1x128xf32, #tpu.memory_space<vmem>>, vector<1x128xf32>
    %2 = vector.shape_cast %1 : vector<1x128xf32> to vector<1x1x128xf32>
    %3 = vector.broadcast %2 : vector<1x1x128xf32> to vector<32x16x128xf32>
    %4 = arith.mulf %0, %3 : vector<32x16x128xf32>
    %c0_4 = arith.constant 0 : index
    %c0_5 = arith.constant 0 : index
    %5 = vector.load %arg3[%c0_4, %c0_5] : memref<1x128xf32, #tpu.memory_space<vmem>>, vector<1x128xf32>
    %6 = vector.shape_cast %5 : vector<1x128xf32> to vector<1x1x128xf32>
    %7 = vector.broadcast %6 : vector<1x1x128xf32> to vector<32x16x128xf32>
    %8 = arith.addf %4, %7 : vector<32x16x128xf32>
    %cst = arith.constant 0.000000e+00 : f32
    %9 = vector.broadcast %cst : f32 to vector<32x16x128xf32>
    %10 = arith.maximumf %8, %9 : vector<32x16x128xf32>
    %11 = arith.truncf %10 : vector<32x16x128xf32> to vector<32x16x128xbf16>
    %c0_6 = arith.constant 0 : index
    %c0_7 = arith.constant 0 : index
    %c0_8 = arith.constant 0 : index
    %12 = vector.load %arg4[%c0_6, %c0_7, %c0_8] : memref<32x16x128xbf16, #tpu.memory_space<vmem>>, vector<32x16x128xbf16>
    tpu.vector_store %arg4[%c0_6, %c0_7, %c0_8], %11 {strides = array<i32>} : memref<32x16x128xbf16, #tpu.memory_space<vmem>>, vector<32x16x128xbf16>,
    return
  }
  func.func @transform_0(%arg0: i32) -> (i32, i32, i32) {
    %c0_i32 = arith.constant 0 : i32
    %c0_i32_0 = arith.constant 0 : i32
    %c0_i32_1 = arith.constant 0 : i32
    return %arg0, %c0_i32, %c0_i32_0 : i32, i32, i32
  }
  func.func @transform_1(%arg0: i32) -> (i32, i32) {
    %c0_i32 = arith.constant 0 : i32
    %c0_i32_0 = arith.constant 0 : i32
    %c0_i32_1 = arith.constant 0 : i32
    return %c0_i32, %c0_i32_0 : i32, i32
  }
  func.func @transform_2(%arg0: i32) -> (i32, i32) {
    %c0_i32 = arith.constant 0 : i32
    %c0_i32_0 = arith.constant 0 : i32
    %c0_i32_1 = arith.constant 0 : i32
    return %c0_i32, %c0_i32_0 : i32, i32
  }
  func.func @transform_3(%arg0: i32) -> (i32, i32, i32) {
    %c0_i32 = arith.constant 0 : i32
    %c0_i32_0 = arith.constant 0 : i32
    %c0_i32_1 = arith.constant 0 : i32
    return %arg0, %c0_i32, %c0_i32_0 : i32, i32, i32
  }
}

module attributes {stable_mosaic.version = 11 : i64} {
  func.func @_bn_relu_pool_kernel(%arg0: i32, %arg1: memref<16x2x16x128xf32, #tpu.memory_space<vmem>>, %arg2: memref<1x128xf32, #tpu.memory_space<vmem>>, %arg3: memref<1x128xf32, #tpu.memory_space<vmem>>, %arg4: memref<16x2x16x128xf32, #tpu.memory_space<vmem>>, %arg5: memref<16x8x128xf32, #tpu.memory_space<vmem>>) attributes {dimension_semantics = [#tpu.dimension_semantics<parallel>], iteration_bounds = array<i64: 1>, scalar_prefetch = 0 : i64, scratch_operands = 0 : i64, tpu.core_type = #tpu.core_type<tc>, window_params = [{transform_indices = @transform_0, window_bounds = array<i64: 16, 2, 16, 128>}, {pipeline_mode = #tpu.pipeline_mode<synchronous>, transform_indices = @transform_1, window_bounds = array<i64: 1, 128>}, {pipeline_mode = #tpu.pipeline_mode<synchronous>, transform_indices = @transform_2, window_bounds = array<i64: 1, 128>}, {transform_indices = @transform_3, window_bounds = array<i64: 16, 2, 16, 128>}, {transform_indices = @transform_4, window_bounds = array<i64: 16, 8, 128>}]} {
    %c0 = arith.constant 0 : index
    %c0_0 = arith.constant 0 : index
    %0 = vector.load %arg2[%c0, %c0_0] : memref<1x128xf32, #tpu.memory_space<vmem>>, vector<1x128xf32>
    %c0_1 = arith.constant 0 : index
    %c0_2 = arith.constant 0 : index
    %1 = vector.load %arg3[%c0_1, %c0_2] : memref<1x128xf32, #tpu.memory_space<vmem>>, vector<1x128xf32>
    %c0_3 = arith.constant 0 : index
    %c0_4 = arith.constant 0 : index
    %c0_5 = arith.constant 0 : index
    %c0_6 = arith.constant 0 : index
    %2 = vector.load %arg1[%c0_3, %c0_4, %c0_5, %c0_6] : memref<16x2x16x128xf32, #tpu.memory_space<vmem>>, vector<16x2x16x128xf32>
    %3 = vector.shape_cast %0 : vector<1x128xf32> to vector<1x1x1x128xf32>
    %4 = vector.broadcast %3 : vector<1x1x1x128xf32> to vector<16x2x16x128xf32>
    %5 = arith.mulf %2, %4 : vector<16x2x16x128xf32>
    %6 = vector.shape_cast %1 : vector<1x128xf32> to vector<1x1x1x128xf32>
    %7 = vector.broadcast %6 : vector<1x1x1x128xf32> to vector<16x2x16x128xf32>
    %8 = arith.addf %5, %7 : vector<16x2x16x128xf32>
    %cst = arith.constant 0.000000e+00 : f32
    %9 = vector.broadcast %cst : f32 to vector<16x2x16x128xf32>
    %10 = arith.maximumf %8, %9 : vector<16x2x16x128xf32>
    %c0_7 = arith.constant 0 : index
    %c0_8 = arith.constant 0 : index
    %c0_9 = arith.constant 0 : index
    %c0_10 = arith.constant 0 : index
    %11 = vector.load %arg4[%c0_7, %c0_8, %c0_9, %c0_10] : memref<16x2x16x128xf32, #tpu.memory_space<vmem>>, vector<16x2x16x128xf32>
    tpu.vector_store %arg4[%c0_7, %c0_8, %c0_9, %c0_10], %10 {strides = array<i32>} : memref<16x2x16x128xf32, #tpu.memory_space<vmem>>, vector<16x2x16x128xf32>,
    %c0_11 = arith.constant 0 : index
    %c0_12 = arith.constant 0 : index
    %c0_13 = arith.constant 0 : index
    %c0_14 = arith.constant 0 : index
    %12 = tpu.strided_load %arg1[%c0_11, %c0_12, %c0_13, %c0_14] {strides = array<i32: 1, 1, 2, 1>} : memref<16x2x16x128xf32, #tpu.memory_space<vmem>>, vector<16x1x8x128xf32>
    %13 = vector.shape_cast %0 : vector<1x128xf32> to vector<1x1x1x128xf32>
    %14 = vector.broadcast %13 : vector<1x1x1x128xf32> to vector<16x1x8x128xf32>
    %15 = arith.mulf %12, %14 : vector<16x1x8x128xf32>
    %16 = vector.shape_cast %1 : vector<1x128xf32> to vector<1x1x1x128xf32>
    %17 = vector.broadcast %16 : vector<1x1x1x128xf32> to vector<16x1x8x128xf32>
    %18 = arith.addf %15, %17 : vector<16x1x8x128xf32>
    %cst_15 = arith.constant 0.000000e+00 : f32
    %19 = vector.broadcast %cst_15 : f32 to vector<16x1x8x128xf32>
    %20 = arith.maximumf %18, %19 : vector<16x1x8x128xf32>
    %c0_16 = arith.constant 0 : index
    %c0_17 = arith.constant 0 : index
    %c1 = arith.constant 1 : index
    %c0_18 = arith.constant 0 : index
    %21 = tpu.strided_load %arg1[%c0_16, %c0_17, %c1, %c0_18] {strides = array<i32: 1, 1, 2, 1>} : memref<16x2x16x128xf32, #tpu.memory_space<vmem>>, vector<16x1x8x128xf32>
    %22 = vector.shape_cast %0 : vector<1x128xf32> to vector<1x1x1x128xf32>
    %23 = vector.broadcast %22 : vector<1x1x1x128xf32> to vector<16x1x8x128xf32>
    %24 = arith.mulf %21, %23 : vector<16x1x8x128xf32>
    %25 = vector.shape_cast %1 : vector<1x128xf32> to vector<1x1x1x128xf32>
    %26 = vector.broadcast %25 : vector<1x1x1x128xf32> to vector<16x1x8x128xf32>
    %27 = arith.addf %24, %26 : vector<16x1x8x128xf32>
    %cst_19 = arith.constant 0.000000e+00 : f32
    %28 = vector.broadcast %cst_19 : f32 to vector<16x1x8x128xf32>
    %29 = arith.maximumf %27, %28 : vector<16x1x8x128xf32>
    %c0_20 = arith.constant 0 : index
    %c1_21 = arith.constant 1 : index
    %c0_22 = arith.constant 0 : index
    %c0_23 = arith.constant 0 : index
    %30 = tpu.strided_load %arg1[%c0_20, %c1_21, %c0_22, %c0_23] {strides = array<i32: 1, 1, 2, 1>} : memref<16x2x16x128xf32, #tpu.memory_space<vmem>>, vector<16x1x8x128xf32>
    %31 = vector.shape_cast %0 : vector<1x128xf32> to vector<1x1x1x128xf32>
    %32 = vector.broadcast %31 : vector<1x1x1x128xf32> to vector<16x1x8x128xf32>
    %33 = arith.mulf %30, %32 : vector<16x1x8x128xf32>
    %34 = vector.shape_cast %1 : vector<1x128xf32> to vector<1x1x1x128xf32>
    %35 = vector.broadcast %34 : vector<1x1x1x128xf32> to vector<16x1x8x128xf32>
    %36 = arith.addf %33, %35 : vector<16x1x8x128xf32>
    %cst_24 = arith.constant 0.000000e+00 : f32
    %37 = vector.broadcast %cst_24 : f32 to vector<16x1x8x128xf32>
    %38 = arith.maximumf %36, %37 : vector<16x1x8x128xf32>
    %c0_25 = arith.constant 0 : index
    %c1_26 = arith.constant 1 : index
    %c1_27 = arith.constant 1 : index
    %c0_28 = arith.constant 0 : index
    %39 = tpu.strided_load %arg1[%c0_25, %c1_26, %c1_27, %c0_28] {strides = array<i32: 1, 1, 2, 1>} : memref<16x2x16x128xf32, #tpu.memory_space<vmem>>, vector<16x1x8x128xf32>
    %40 = vector.shape_cast %0 : vector<1x128xf32> to vector<1x1x1x128xf32>
    %41 = vector.broadcast %40 : vector<1x1x1x128xf32> to vector<16x1x8x128xf32>
    %42 = arith.mulf %39, %41 : vector<16x1x8x128xf32>
    %43 = vector.shape_cast %1 : vector<1x128xf32> to vector<1x1x1x128xf32>
    %44 = vector.broadcast %43 : vector<1x1x1x128xf32> to vector<16x1x8x128xf32>
    %45 = arith.addf %42, %44 : vector<16x1x8x128xf32>
    %cst_29 = arith.constant 0.000000e+00 : f32
    %46 = vector.broadcast %cst_29 : f32 to vector<16x1x8x128xf32>
    %47 = arith.maximumf %45, %46 : vector<16x1x8x128xf32>
    %48 = arith.maximumf %20, %29 : vector<16x1x8x128xf32>
    %49 = arith.maximumf %38, %47 : vector<16x1x8x128xf32>
    %50 = arith.maximumf %48, %49 : vector<16x1x8x128xf32>
    %51 = vector.shape_cast %50 : vector<16x1x8x128xf32> to vector<16x8x128xf32>
    %c0_30 = arith.constant 0 : index
    %c0_31 = arith.constant 0 : index
    %c0_32 = arith.constant 0 : index
    %52 = vector.load %arg5[%c0_30, %c0_31, %c0_32] : memref<16x8x128xf32, #tpu.memory_space<vmem>>, vector<16x8x128xf32>
    tpu.vector_store %arg5[%c0_30, %c0_31, %c0_32], %51 {strides = array<i32>} : memref<16x8x128xf32, #tpu.memory_space<vmem>>, vector<16x8x128xf32>,
    return
  }
  func.func @transform_0(%arg0: i32) -> (i32, i32, i32, i32) {
    %c0_i32 = arith.constant 0 : i32
    %c0_i32_0 = arith.constant 0 : i32
    %c0_i32_1 = arith.constant 0 : i32
    %c0_i32_2 = arith.constant 0 : i32
    return %arg0, %c0_i32, %c0_i32_0, %c0_i32_1 : i32, i32, i32, i32
  }
  func.func @transform_1(%arg0: i32) -> (i32, i32) {
    %c0_i32 = arith.constant 0 : i32
    %c0_i32_0 = arith.constant 0 : i32
    %c0_i32_1 = arith.constant 0 : i32
    return %c0_i32, %c0_i32_0 : i32, i32
  }
  func.func @transform_2(%arg0: i32) -> (i32, i32) {
    %c0_i32 = arith.constant 0 : i32
    %c0_i32_0 = arith.constant 0 : i32
    %c0_i32_1 = arith.constant 0 : i32
    return %c0_i32, %c0_i32_0 : i32, i32
  }
  func.func @transform_3(%arg0: i32) -> (i32, i32, i32, i32) {
    %c0_i32 = arith.constant 0 : i32
    %c0_i32_0 = arith.constant 0 : i32
    %c0_i32_1 = arith.constant 0 : i32
    %c0_i32_2 = arith.constant 0 : i32
    return %arg0, %c0_i32, %c0_i32_0, %c0_i32_1 : i32, i32, i32, i32
  }
  func.func @transform_4(%arg0: i32) -> (i32, i32, i32) {
    %c0_i32 = arith.constant 0 : i32
    %c0_i32_0 = arith.constant 0 : i32
    %c0_i32_1 = arith.constant 0 : i32
    return %arg0, %c0_i32, %c0_i32_0 : i32, i32, i32
  }
}

</mosaic_0001>

<bundles_post_ra>
// kernel: unet_encoder_block.5
= control target key start
LH: loop header
LB: loop body
LE: loop exit
PB: predicated region body
PF: predicated region fallthrough
CT: control target
= control target key end

     0   :  { %s1375_s0 = inlined_call_operand.vmem [shape: f32[32,16,128], index: 0, kind: input, shape index: {}]   ;;  %s1376_s1 = inlined_call_operand.vmem [shape: f32[1,128], index: 1, kind: input, shape index: {}]   ;;  %s1377_s2 = inlined_call_operand.vmem [shape: f32[1,128], index: 2, kind: input, shape index: {}]   ;;  %s1378_s3 = inlined_call_operand.vmem [shape: bf16[32,16,128], index: 3, kind: output, shape index: {}]  }
   0x1   :  { %v14_v0 = vld [vmem:[%s1375_s0] sm:$0xff]  ;;  %v15_v1 = vld [vmem:[%s1375_s0 + $0x8] sm:$0xff]  ;;  %v16_v6 = vld [vmem:[%s1375_s0 + $0x10] sm:$0xff] }
   0x2   :  { %v958_v2 = vld [vmem:[%s1376_s1] ss:$0 sm:$0xff]  ;;  %v17_v7 = vld [vmem:[%s1375_s0 + $0x18] sm:$0xff]  ;;  %v19_v11 = vld [vmem:[%s1375_s0 + $0x28] sm:$0xff] }
   0x3   :  { %v85_v3 = vmul.f32 %v958_v2, %v14_v0  ;;  %v86_v4 = vmul.f32 %v958_v2, %v15_v1  ;;  %v965_v5 = vld [vmem:[%s1377_s2] ss:$0 sm:$0xff]  ;;  %v87_v8 = vmul.f32 %v958_v2, %v16_v6  ;;  %v88_v9 = vmul.f32 %v958_v2, %v17_v7  ;;  %v20_v12 = vld [vmem:[%s1375_s0 + $0x30] sm:$0xff]  ;;  %v21_v17 = vld [vmem:[%s1375_s0 + $0x38] sm:$0xff] }
   0x4   :  { %v18_v10 = vld [vmem:[%s1375_s0 + $0x20] sm:$0xff]  ;;  %v90_v16 = vmul.f32 %v958_v2, %v19_v11  ;;  %v91_v20 = vmul.f32 %v958_v2, %v20_v12  ;;  %v92_v21 = vmul.f32 %v958_v2, %v21_v17  ;;  %v23_v27 = vld [vmem:[%s1375_s0 + $0x48] sm:$0xff]  ;;  %v24_v32 = vld [vmem:[%s1375_s0 + $0x50] sm:$0xff] }
   0x5   :  { %v156_v13 = vadd.f32 %v965_v5, %v85_v3  ;;  %v157_v14 = vadd.f32 %v965_v5, %v86_v4  ;;  %v89_v15 = vmul.f32 %v958_v2, %v18_v10  ;;  %v158_v18 = vadd.f32 %v965_v5, %v87_v8  ;;  %v22_v22 = vld [vmem:[%s1375_s0 + $0x40] sm:$0xff]  ;;  %v25_v33 = vld [vmem:[%s1375_s0 + $0x58] sm:$0xff]  ;;  %v27_v39 = vld [vmem:[%s1375_s0 + $0x68] sm:$0xff] }
   0x6   :  { %v159_v19 = vadd.f32 %v965_v5, %v88_v9  ;;  %v161_v26 = vadd.f32 %v965_v5, %v90_v16  ;;  %v162_v30 = vadd.f32 %v965_v5, %v91_v20  ;;  %v163_v31 = vadd.f32 %v965_v5, %v92_v21  ;;  %v26_v38 = vld [vmem:[%s1375_s0 + $0x60] sm:$0xff]  ;;  %v28_v44 = vld [vmem:[%s1375_s0 + $0x70] sm:$0xff]  ;;  %v29_v49 = vld [vmem:[%s1375_s0 + $0x78] sm:$0xff] }
   0x7   :  { %v220_v23 = vmax.f32 %v156_v13, 0.0  ;;  %v221_v24 = vmax.f32 %v157_v14, 0.0  ;;  %v160_v25 = vadd.f32 %v965_v5, %v89_v15  ;;  %v222_v28 = vmax.f32 %v158_v18, 0.0  ;;  %v30_v54 = vld [vmem:[%s1375_s0 + $0x80] sm:$0xff]  ;;  %v31_v63 = vld [vmem:[%s1375_s0 + $0x88] sm:$0xff]  ;;  %v32_v6 = vld [vmem:[%s1375_s0 + $0x90] sm:$0xff] }
   0x8   :  { %v223_v29 = vmax.f32 %v159_v19, 0.0  ;;  %v225_v36 = vmax.f32 %v161_v26, 0.0  ;;  %v93_v37 = vmul.f32 %v958_v2, %v22_v22  ;;  %v226_v41 = vmax.f32 %v162_v30, 0.0  ;;  %v33_v7 = vld [vmem:[%s1375_s0 + $0x98] sm:$0xff]  ;;  %v34_v12 = vld [vmem:[%s1375_s0 + $0xa0] sm:$0xff]  ;;  %v35_v13 = vld [vmem:[%s1375_s0 + $0xa8] sm:$0xff] }
   0x9   :  { %v741_v34 = vpack.c.bf16 %v221_v24, %v220_v23  ;;  %v224_v35 = vmax.f32 %v160_v25, 0.0  ;;  %v227_v42 = vmax.f32 %v163_v31, 0.0  ;;  %v94_v43 = vmul.f32 %v958_v2, %v23_v27  ;;  %v36_v18 = vld [vmem:[%s1375_s0 + $0xb0] sm:$0xff]  ;;  %v37_v23 = vld [vmem:[%s1375_s0 + $0xb8] sm:$0xff] }
   0xa   :  { %v746_v40 = vpack.c.bf16 %v223_v29, %v222_v28  ;;  %v164_v46 = vadd.f32 %v965_v5, %v93_v37  ;;  %v95_v47 = vmul.f32 %v958_v2, %v24_v32  ;;  %v96_v48 = vmul.f32 %v958_v2, %v25_v33  ;;  %v38_v28 = vld [vmem:[%s1375_s0 + $0xc0] sm:$0xff]  ;;  %v39_v37 = vld [vmem:[%s1375_s0 + $0xc8] sm:$0xff] }
   0xb   :  { %742 = vst [vmem:[%s1378_s3] sm:$0xff] %v741_v34   ;;  %v751_v45 = vpack.c.bf16 %v225_v36, %v224_v35  ;;  %v756_v50 = vpack.c.bf16 %v227_v42, %v226_v41  ;;  %v165_v51 = vadd.f32 %v965_v5, %v94_v43  ;;  %v97_v52 = vmul.f32 %v958_v2, %v26_v38  ;;  %v40_v42 = vld [vmem:[%s1375_s0 + $0xd0] sm:$0xff]  ;;  %v41_v43 = vld [vmem:[%s1375_s0 + $0xd8] sm:$0xff] }
   0xc   :  { %898 = vst [vmem:[%s1378_s3 + $0x8] sm:$0xff] %v746_v40   ;;  %v98_v53 = vmul.f32 %v958_v2, %v27_v39  ;;  %v228_v55 = vmax.f32 %v164_v46, 0.0  ;;  %v166_v56 = vadd.f32 %v965_v5, %v95_v47  ;;  %v167_v57 = vadd.f32 %v965_v5, %v96_v48  ;;  %v42_v48 = vld [vmem:[%s1375_s0 + $0xe0] sm:$0xff] }
   0xd   :  { %899 = vst [vmem:[%s1378_s3 + $0x10] sm:$0xff] %v751_v45   ;;  %v99_v58 = vmul.f32 %v958_v2, %v28_v44  ;;  %900 = vst [vmem:[%s1378_s3 + $0x18] sm:$0xff] %v756_v50   ;;  %v229_v59 = vmax.f32 %v165_v51, 0.0  ;;  %v168_v60 = vadd.f32 %v965_v5, %v97_v52  ;;  %v100_v62 = vmul.f32 %v958_v2, %v29_v49  ;;  %v43_v49 = vld [vmem:[%s1375_s0 + $0xe8] sm:$0xff] }
   0xe   :  { %v169_v61 = vadd.f32 %v965_v5, %v98_v53  ;;  %v230_v0 = vmax.f32 %v166_v56, 0.0  ;;  %v231_v1 = vmax.f32 %v167_v57, 0.0  ;;  %v101_v4 = vmul.f32 %v958_v2, %v30_v54  ;;  %v44_v54 = vld [vmem:[%s1375_s0 + $0xf0] sm:$0xff] }
   0xf   :  { %v170_v3 = vadd.f32 %v965_v5, %v99_v58  ;;  %v761_v8 = vpack.c.bf16 %v229_v59, %v228_v55  ;;  %v232_v9 = vmax.f32 %v168_v60, 0.0  ;;  %v171_v11 = vadd.f32 %v965_v5, %v100_v62  ;;  %v45_v59 = vld [vmem:[%s1375_s0 + $0xf8] sm:$0xff] }
  0x10   :  { %v233_v10 = vmax.f32 %v169_v61, 0.0  ;;  %v766_v14 = vpack.c.bf16 %v231_v1, %v230_v0  ;;  %v102_v16 = vmul.f32 %v958_v2, %v31_v63  ;;  %v172_v17 = vadd.f32 %v965_v5, %v101_v4  ;;  %v46_v0 = vld [vmem:[%s1375_s0 + $0x100] sm:$0xff] }
  0x11   :  { %v234_v15 = vmax.f32 %v170_v3, 0.0  ;;  %901 = vst [vmem:[%s1378_s3 + $0x20] sm:$0xff] %v761_v8   ;;  %v235_v20 = vmax.f32 %v171_v11, 0.0  ;;  %v103_v21 = vmul.f32 %v958_v2, %v32_v6  ;;  %v104_v22 = vmul.f32 %v958_v2, %v33_v7  ;;  %v47_v11 = vld [vmem:[%s1375_s0 + $0x108] sm:$0xff] }
  0x12   :  { %v771_v19 = vpack.c.bf16 %v233_v10, %v232_v9  ;;  %902 = vst [vmem:[%s1378_s3 + $0x28] sm:$0xff] %v766_v14   ;;  %v173_v24 = vadd.f32 %v965_v5, %v102_v16  ;;  %v236_v25 = vmax.f32 %v172_v17, 0.0  ;;  %v105_v26 = vmul.f32 %v958_v2, %v34_v12  ;;  %v48_v16 = vld [vmem:[%s1375_s0 + $0x110] sm:$0xff]  ;;  %v49_v17 = vld [vmem:[%s1375_s0 + $0x118] sm:$0xff] }
  0x13   :  { %v106_v27 = vmul.f32 %v958_v2, %v35_v13  ;;  %v776_v29 = vpack.c.bf16 %v235_v20, %v234_v15  ;;  %v174_v30 = vadd.f32 %v965_v5, %v103_v21  ;;  %v175_v31 = vadd.f32 %v965_v5, %v104_v22  ;;  %v50_v22 = vld [vmem:[%s1375_s0 + $0x120] sm:$0xff] }
  0x14   :  { %903 = vst [vmem:[%s1378_s3 + $0x30] sm:$0xff] %v771_v19   ;;  %v107_v32 = vmul.f32 %v958_v2, %v36_v18  ;;  %v237_v33 = vmax.f32 %v173_v24, 0.0  ;;  %v176_v34 = vadd.f32 %v965_v5, %v105_v26  ;;  %v108_v36 = vmul.f32 %v958_v2, %v37_v23  ;;  %v51_v23 = vld [vmem:[%s1375_s0 + $0x128] sm:$0xff] }
  0x15   :  { %v177_v35 = vadd.f32 %v965_v5, %v106_v27  ;;  %904 = vst [vmem:[%s1378_s3 + $0x38] sm:$0xff] %v776_v29   ;;  %v238_v38 = vmax.f32 %v174_v30, 0.0  ;;  %v239_v39 = vmax.f32 %v175_v31, 0.0  ;;  %v109_v41 = vmul.f32 %v958_v2, %v38_v28  ;;  %v52_v28 = vld [vmem:[%s1375_s0 + $0x130] sm:$0xff] }
  0x16   :  { %v178_v40 = vadd.f32 %v965_v5, %v107_v32  ;;  %v781_v44 = vpack.c.bf16 %v237_v33, %v236_v25  ;;  %v240_v45 = vmax.f32 %v176_v34, 0.0  ;;  %v179_v47 = vadd.f32 %v965_v5, %v108_v36  ;;  %v53_v33 = vld [vmem:[%s1375_s0 + $0x138] sm:$0xff] }
  0x17   :  { %v241_v46 = vmax.f32 %v177_v35, 0.0  ;;  %v786_v50 = vpack.c.bf16 %v239_v39, %v238_v38  ;;  %v110_v52 = vmul.f32 %v958_v2, %v39_v37  ;;  %v180_v53 = vadd.f32 %v965_v5, %v109_v41  ;;  %v54_v38 = vld [vmem:[%s1375_s0 + $0x140] sm:$0xff] }
  0x18   :  { %v242_v51 = vmax.f32 %v178_v40, 0.0  ;;  %905 = vst [vmem:[%s1378_s3 + $0x40] sm:$0xff] %v781_v44   ;;  %v243_v56 = vmax.f32 %v179_v47, 0.0  ;;  %v111_v57 = vmul.f32 %v958_v2, %v40_v42  ;;  %v112_v58 = vmul.f32 %v958_v2, %v41_v43  ;;  %v55_v47 = vld [vmem:[%s1375_s0 + $0x148] sm:$0xff] }
  0x19   :  { %v791_v55 = vpack.c.bf16 %v241_v46, %v240_v45  ;;  %906 = vst [vmem:[%s1378_s3 + $0x48] sm:$0xff] %v786_v50   ;;  %v181_v60 = vadd.f32 %v965_v5, %v110_v52  ;;  %v244_v61 = vmax.f32 %v180_v53, 0.0  ;;  %v113_v62 = vmul.f32 %v958_v2, %v42_v48  ;;  %v56_v52 = vld [vmem:[%s1375_s0 + $0x150] sm:$0xff]  ;;  %v57_v53 = vld [vmem:[%s1375_s0 + $0x158] sm:$0xff] }
  0x1a   :  { %v114_v63 = vmul.f32 %v958_v2, %v43_v49  ;;  %v796_v1 = vpack.c.bf16 %v243_v56, %v242_v51  ;;  %v182_v3 = vadd.f32 %v965_v5, %v111_v57  ;;  %v183_v4 = vadd.f32 %v965_v5, %v112_v58  ;;  %v58_v58 = vld [vmem:[%s1375_s0 + $0x160] sm:$0xff] }
  0x1b   :  { %907 = vst [vmem:[%s1378_s3 + $0x50] sm:$0xff] %v791_v55   ;;  %v115_v6 = vmul.f32 %v958_v2, %v44_v54  ;;  %v245_v7 = vmax.f32 %v181_v60, 0.0  ;;  %v184_v8 = vadd.f32 %v965_v5, %v113_v62  ;;  %v116_v10 = vmul.f32 %v958_v2, %v45_v59  ;;  %v59_v59 = vld [vmem:[%s1375_s0 + $0x168] sm:$0xff] }
  0x1c   :  { %v185_v9 = vadd.f32 %v965_v5, %v114_v63  ;;  %908 = vst [vmem:[%s1378_s3 + $0x58] sm:$0xff] %v796_v1   ;;  %v246_v12 = vmax.f32 %v182_v3, 0.0  ;;  %v247_v13 = vmax.f32 %v183_v4, 0.0  ;;  %v117_v15 = vmul.f32 %v958_v2, %v46_v0  ;;  %v60_v0 = vld [vmem:[%s1375_s0 + $0x170] sm:$0xff] }
  0x1d   :  { %v186_v14 = vadd.f32 %v965_v5, %v115_v6  ;;  %v801_v18 = vpack.c.bf16 %v245_v7, %v244_v61  ;;  %v248_v19 = vmax.f32 %v184_v8, 0.0  ;;  %v187_v21 = vadd.f32 %v965_v5, %v116_v10  ;;  %v61_v7 = vld [vmem:[%s1375_s0 + $0x178] sm:$0xff] }
  0x1e   :  { %v249_v20 = vmax.f32 %v185_v9, 0.0  ;;  %v806_v24 = vpack.c.bf16 %v247_v13, %v246_v12  ;;  %v118_v26 = vmul.f32 %v958_v2, %v47_v11  ;;  %v188_v27 = vadd.f32 %v965_v5, %v117_v15  ;;  %v62_v12 = vld [vmem:[%s1375_s0 + $0x180] sm:$0xff] }
  0x1f   :  { %v250_v25 = vmax.f32 %v186_v14, 0.0  ;;  %909 = vst [vmem:[%s1378_s3 + $0x60] sm:$0xff] %v801_v18   ;;  %v251_v30 = vmax.f32 %v187_v21, 0.0  ;;  %v119_v31 = vmul.f32 %v958_v2, %v48_v16  ;;  %v120_v32 = vmul.f32 %v958_v2, %v49_v17  ;;  %v63_v21 = vld [vmem:[%s1375_s0 + $0x188] sm:$0xff] }
  0x20   :  { %v811_v29 = vpack.c.bf16 %v249_v20, %v248_v19  ;;  %910 = vst [vmem:[%s1378_s3 + $0x68] sm:$0xff] %v806_v24   ;;  %v189_v34 = vadd.f32 %v965_v5, %v118_v26  ;;  %v252_v35 = vmax.f32 %v188_v27, 0.0  ;;  %v121_v36 = vmul.f32 %v958_v2, %v50_v22  ;;  %v64_v26 = vld [vmem:[%s1375_s0 + $0x190] sm:$0xff]  ;;  %v65_v27 = vld [vmem:[%s1375_s0 + $0x198] sm:$0xff] }
  0x21   :  { %v122_v37 = vmul.f32 %v958_v2, %v51_v23  ;;  %v816_v39 = vpack.c.bf16 %v251_v30, %v250_v25  ;;  %v190_v40 = vadd.f32 %v965_v5, %v119_v31  ;;  %v191_v41 = vadd.f32 %v965_v5, %v120_v32  ;;  %v66_v32 = vld [vmem:[%s1375_s0 + $0x1a0] sm:$0xff] }
  0x22   :  { %911 = vst [vmem:[%s1378_s3 + $0x70] sm:$0xff] %v811_v29   ;;  %v123_v42 = vmul.f32 %v958_v2, %v52_v28  ;;  %v253_v43 = vmax.f32 %v189_v34, 0.0  ;;  %v192_v44 = vadd.f32 %v965_v5, %v121_v36  ;;  %v124_v46 = vmul.f32 %v958_v2, %v53_v33  ;;  %v67_v33 = vld [vmem:[%s1375_s0 + $0x1a8] sm:$0xff] }
  0x23   :  { %v193_v45 = vadd.f32 %v965_v5, %v122_v37  ;;  %912 = vst [vmem:[%s1378_s3 + $0x78] sm:$0xff] %v816_v39   ;;  %v254_v48 = vmax.f32 %v190_v40, 0.0  ;;  %v255_v49 = vmax.f32 %v191_v41, 0.0  ;;  %v125_v51 = vmul.f32 %v958_v2, %v54_v38  ;;  %v68_v38 = vld [vmem:[%s1375_s0 + $0x1b0] sm:$0xff] }
  0x24   :  { %v194_v50 = vadd.f32 %v965_v5, %v123_v42  ;;  %v821_v54 = vpack.c.bf16 %v253_v43, %v252_v35  ;;  %v256_v55 = vmax.f32 %v192_v44, 0.0  ;;  %v195_v57 = vadd.f32 %v965_v5, %v124_v46  ;;  %v69_v43 = vld [vmem:[%s1375_s0 + $0x1b8] sm:$0xff] }
  0x25   :  { %v257_v56 = vmax.f32 %v193_v45, 0.0  ;;  %v826_v60 = vpack.c.bf16 %v255_v49, %v254_v48  ;;  %v126_v62 = vmul.f32 %v958_v2, %v55_v47  ;;  %v196_v63 = vadd.f32 %v965_v5, %v125_v51  ;;  %v70_v48 = vld [vmem:[%s1375_s0 + $0x1c0] sm:$0xff] }
  0x26   :  { %v258_v61 = vmax.f32 %v194_v50, 0.0  ;;  %913 = vst [vmem:[%s1378_s3 + $0x80] sm:$0xff] %v821_v54   ;;  %v259_v3 = vmax.f32 %v195_v57, 0.0  ;;  %v127_v4 = vmul.f32 %v958_v2, %v56_v52  ;;  %v128_v6 = vmul.f32 %v958_v2, %v57_v53  ;;  %v71_v57 = vld [vmem:[%s1375_s0 + $0x1c8] sm:$0xff] }
  0x27   :  { %v831_v1 = vpack.c.bf16 %v257_v56, %v256_v55  ;;  %914 = vst [vmem:[%s1378_s3 + $0x88] sm:$0xff] %v826_v60   ;;  %v197_v8 = vadd.f32 %v965_v5, %v126_v62  ;;  %v260_v9 = vmax.f32 %v196_v63, 0.0  ;;  %v129_v10 = vmul.f32 %v958_v2, %v58_v58  ;;  %v72_v62 = vld [vmem:[%s1375_s0 + $0x1d0] sm:$0xff]  ;;  %v73_v63 = vld [vmem:[%s1375_s0 + $0x1d8] sm:$0xff] }
  0x28   :  { %v130_v11 = vmul.f32 %v958_v2, %v59_v59  ;;  %v836_v13 = vpack.c.bf16 %v259_v3, %v258_v61  ;;  %v198_v14 = vadd.f32 %v965_v5, %v127_v4  ;;  %v199_v15 = vadd.f32 %v965_v5, %v128_v6  ;;  %v74_v6 = vld [vmem:[%s1375_s0 + $0x1e0] sm:$0xff] }
  0x29   :  { %915 = vst [vmem:[%s1378_s3 + $0x90] sm:$0xff] %v831_v1   ;;  %v131_v16 = vmul.f32 %v958_v2, %v60_v0  ;;  %v261_v17 = vmax.f32 %v197_v8, 0.0  ;;  %v200_v18 = vadd.f32 %v965_v5, %v129_v10  ;;  %v132_v20 = vmul.f32 %v958_v2, %v61_v7  ;;  %v75_v7 = vld [vmem:[%s1375_s0 + $0x1e8] sm:$0xff] }
  0x2a   :  { %v201_v19 = vadd.f32 %v965_v5, %v130_v11  ;;  %916 = vst [vmem:[%s1378_s3 + $0x98] sm:$0xff] %v836_v13   ;;  %v262_v22 = vmax.f32 %v198_v14, 0.0  ;;  %v263_v23 = vmax.f32 %v199_v15, 0.0  ;;  %v133_v25 = vmul.f32 %v958_v2, %v62_v12  ;;  %v76_v12 = vld [vmem:[%s1375_s0 + $0x1f0] sm:$0xff] }
  0x2b   :  { %v202_v24 = vadd.f32 %v965_v5, %v131_v16  ;;  %v841_v28 = vpack.c.bf16 %v261_v17, %v260_v9  ;;  %v264_v29 = vmax.f32 %v200_v18, 0.0  ;;  %v203_v31 = vadd.f32 %v965_v5, %v132_v20  ;;  %v77_v17 = vld [vmem:[%s1375_s0 + $0x1f8] sm:$0xff] }
  0x2c   :  { %v265_v30 = vmax.f32 %v201_v19, 0.0  ;;  %v846_v34 = vpack.c.bf16 %v263_v23, %v262_v22  ;;  %v134_v36 = vmul.f32 %v958_v2, %v63_v21  ;;  %v204_v37 = vadd.f32 %v965_v5, %v133_v25 }
  0x2d   :  { %v266_v35 = vmax.f32 %v202_v24, 0.0  ;;  %917 = vst [vmem:[%s1378_s3 + $0xa0] sm:$0xff] %v841_v28   ;;  %v267_v40 = vmax.f32 %v203_v31, 0.0  ;;  %v135_v41 = vmul.f32 %v958_v2, %v64_v26  ;;  %v136_v42 = vmul.f32 %v958_v2, %v65_v27 }
  0x2e   :  { %v851_v39 = vpack.c.bf16 %v265_v30, %v264_v29  ;;  %918 = vst [vmem:[%s1378_s3 + $0xa8] sm:$0xff] %v846_v34   ;;  %v205_v44 = vadd.f32 %v965_v5, %v134_v36  ;;  %v268_v45 = vmax.f32 %v204_v37, 0.0  ;;  %v137_v46 = vmul.f32 %v958_v2, %v66_v32 }
  0x2f   :  { %v138_v47 = vmul.f32 %v958_v2, %v67_v33  ;;  %v856_v49 = vpack.c.bf16 %v267_v40, %v266_v35  ;;  %v206_v50 = vadd.f32 %v965_v5, %v135_v41  ;;  %v207_v51 = vadd.f32 %v965_v5, %v136_v42 }
  0x30   :  { %919 = vst [vmem:[%s1378_s3 + $0xb0] sm:$0xff] %v851_v39   ;;  %v139_v52 = vmul.f32 %v958_v2, %v68_v38  ;;  %v269_v53 = vmax.f32 %v205_v44, 0.0  ;;  %v208_v54 = vadd.f32 %v965_v5, %v137_v46  ;;  %v140_v56 = vmul.f32 %v958_v2, %v69_v43 }
  0x31   :  { %v209_v55 = vadd.f32 %v965_v5, %v138_v47  ;;  %920 = vst [vmem:[%s1378_s3 + $0xb8] sm:$0xff] %v856_v49   ;;  %v270_v58 = vmax.f32 %v206_v50, 0.0  ;;  %v271_v59 = vmax.f32 %v207_v51, 0.0  ;;  %v141_v61 = vmul.f32 %v958_v2, %v70_v48 }
  0x32   :  { %v210_v60 = vadd.f32 %v965_v5, %v139_v52  ;;  %v861_v0 = vpack.c.bf16 %v269_v53, %v268_v45  ;;  %v272_v1 = vmax.f32 %v208_v54, 0.0  ;;  %v211_v4 = vadd.f32 %v965_v5, %v140_v56 }
  0x33   :  { %v273_v3 = vmax.f32 %v209_v55, 0.0  ;;  %v866_v8 = vpack.c.bf16 %v271_v59, %v270_v58  ;;  %v142_v10 = vmul.f32 %v958_v2, %v71_v57  ;;  %v212_v11 = vadd.f32 %v965_v5, %v141_v61 }
  0x34   :  { %v274_v9 = vmax.f32 %v210_v60, 0.0  ;;  %921 = vst [vmem:[%s1378_s3 + $0xc0] sm:$0xff] %v861_v0   ;;  %v275_v14 = vmax.f32 %v211_v4, 0.0  ;;  %v143_v15 = vmul.f32 %v958_v2, %v72_v62  ;;  %v144_v16 = vmul.f32 %v958_v2, %v73_v63 }
  0x35   :  { %v871_v13 = vpack.c.bf16 %v273_v3, %v272_v1  ;;  %922 = vst [vmem:[%s1378_s3 + $0xc8] sm:$0xff] %v866_v8   ;;  %v213_v18 = vadd.f32 %v965_v5, %v142_v10  ;;  %v276_v19 = vmax.f32 %v212_v11, 0.0  ;;  %v145_v20 = vmul.f32 %v958_v2, %v74_v6 }
  0x36   :  { %v146_v21 = vmul.f32 %v958_v2, %v75_v7  ;;  %v876_v22 = vpack.c.bf16 %v275_v14, %v274_v9  ;;  %v214_v23 = vadd.f32 %v965_v5, %v143_v15  ;;  %v215_v24 = vadd.f32 %v965_v5, %v144_v16 }
  0x37   :  { %923 = vst [vmem:[%s1378_s3 + $0xd0] sm:$0xff] %v871_v13   ;;  %v147_v25 = vmul.f32 %v958_v2, %v76_v12  ;;  %v277_v26 = vmax.f32 %v213_v18, 0.0  ;;  %v216_v27 = vadd.f32 %v965_v5, %v145_v20  ;;  %v148_v29 = vmul.f32 %v958_v2, %v77_v17 }
  0x38   :  { %v217_v28 = vadd.f32 %v965_v5, %v146_v21  ;;  %924 = vst [vmem:[%s1378_s3 + $0xd8] sm:$0xff] %v876_v22   ;;  %v278_v30 = vmax.f32 %v214_v23, 0.0  ;;  %v279_v31 = vmax.f32 %v215_v24, 0.0 }
  0x39   :  { %v218_v32 = vadd.f32 %v965_v5, %v147_v25  ;;  %v881_v33 = vpack.c.bf16 %v277_v26, %v276_v19  ;;  %v280_v34 = vmax.f32 %v216_v27, 0.0  ;;  %v219_v36 = vadd.f32 %v965_v5, %v148_v29 }
  0x3a   :  { %v281_v35 = vmax.f32 %v217_v28, 0.0  ;;  %v886_v37 = vpack.c.bf16 %v279_v31, %v278_v30 }
  0x3b   :  { %v282_v38 = vmax.f32 %v218_v32, 0.0  ;;  %925 = vst [vmem:[%s1378_s3 + $0xe0] sm:$0xff] %v881_v33   ;;  %v283_v39 = vmax.f32 %v219_v36, 0.0 }
  0x3c   :  { %v891_v2 = vpack.c.bf16 %v281_v35, %v280_v34  ;;  %926 = vst [vmem:[%s1378_s3 + $0xe8] sm:$0xff] %v886_v37  }
  0x3d   :  { %v896_v40 = vpack.c.bf16 %v283_v39, %v282_v38 }
  0x3e   :  { %927 = vst [vmem:[%s1378_s3 + $0xf0] sm:$0xff] %v891_v2  }
  0x3f   :  { %928 = vst [vmem:[%s1378_s3 + $0xf8] sm:$0xff] %v896_v40  }

// kernel: unet_encoder_block.4
= control target key start
LH: loop header
LB: loop body
LE: loop exit
PB: predicated region body
PF: predicated region fallthrough
CT: control target
= control target key end

     0   :  { %s2428_s24 = smov 0   ;;  %s2430_s25 = smov 0   ;;  %s2852_s0 = inlined_call_operand.vmem [shape: bf16[2,18,18,128], index: 0, kind: input, shape index: {}, may-alias: {0,1,2}]   ;;  %s2853_s1 = inlined_call_operand.vmem [shape: bf16[2,18,18,128], index: 1, kind: input, shape index: {}, may-alias: {0,1,2}]   ;;  %s2854_s2 = inlined_call_operand.vmem [shape: bf16[2,18,18,128], index: 2, kind: input, shape index: {}, may-alias: {0,1,2}]   ;;  %s2855_s3 = inlined_call_operand.vmem [shape: bf16[9,128,128], index: 3, kind: input, shape index: {}]   ;;  %s2856_s4 = inlined_call_operand.vmem [shape: f32[1,128], index: 4, kind: input, shape index: {}]   ;;  %s2857_s5 = inlined_call_operand.vmem [shape: f32[2,16,16,128], index: 5, kind: output, shape index: {0}]   ;;  %s2858_s6 = inlined_call_operand.vmem [shape: f32[2,16,1,128], index: 6, kind: output, shape index: {1}]   ;;  %s2859_s7 = inlined_call_operand.vmem [shape: f32[2,16,1,128], index: 7, kind: output, shape index: {2}]  }
   0x1   :  { %s2432_s26 = smov 0   ;;  %s2434_s27 = smov 0  }
   0x2   :  { %s2436_s28 = smov 0  }
   0x3 LB: > { %s27_s29 = sadd.s32 1, %s2376_s26  ;;  %s30_s30 = sadd.s32 1, %s2380_s27  ;;  %s2384_s28 = sphi %s2436_s28, %s18_s28   ;;  %s2380_s27 = sphi %s2434_s27, %s2863_s27   ;;  %s2376_s26 = sphi %s2432_s26, %s2862_s26   ;;  %s2372_s25 = sphi %s2430_s25, %s2861_s25   ;;  %s2368_s24 = sphi %s2428_s24, %s2860_s24  }
   0x4   : > { %p28_p0 = scmp.ge.s32.totalorder %s27_s29, 16  ;;  %p1743_p1 = scmp.ge.s32.totalorder %s2384_s28, 1 }
   0x5   : > { %p306_p2 = scmp.lt.s32.totalorder %s2384_s28, 33 }
   0x6   : > { %s2865_s29 = smov (%p28_p0, %s27_s29), 0  ;;  %s2867_s30 = smov (!%p28_p0, %s30_s30), %s2380_s27 }
   0x7   : > { %p307_p3 = pnand %p1743_p1, %p306_p2  ;;  %p32_p4 = scmp.ge.s32.totalorder %s2867_s30, 2 }
   0x8   : > { %v2268_v0 = vld [vmem:[%s2855_s3 + $0x40] sm:$0xff] (!%p307_p3)   ;;  %v2386_v1 = vmov (!%p307_p3), 0.0   ;;  %v2270_v3 = vld [vmem:[%s2855_s3 + $0x48] sm:$0xff] (!%p307_p3)   ;;  %vm2387_vm0 = vmmov (!%p307_p3), 0   ;;  %p380_p5 = scmp.lt.s32.totalorder (!%p307_p3), %s2372_s25, 1  ;;  %p382_p6 = scmp.lt.s32.totalorder (!%p307_p3), %s2368_s24, 17 }
   0x9   : > { %s2869_s30 = smov (%p32_p4, %s2867_s30), 0  ;;  %310 = sbr.rel (%p307_p3) target bundleno = 405 (0x195), region = 40 }
   0xa   : > { %2042 = vmatprep.subr.bf16.mxu0 (!%p307_p3), %v2386_v1  ;;  %2062 = vmatprep.subr.bf16.mxu1 (!%p307_p3), %v2386_v1  ;;  %v2269_v2 = vld [vmem:[%s2855_s3] sm:$0xff] (!%p307_p3)   ;;  %v2271_v4 = vld [vmem:[%s2855_s3 + $0x8] sm:$0xff] (!%p307_p3)   ;;  %v2272_v5 = vld [vmem:[%s2855_s3 + $0x50] sm:$0xff] (!%p307_p3)   ;;  %s389_s13 = sadd.s32 (!%p307_p3), 1, %s2368_s24  ;;  %vm479_vm1 = vsmask.f32 (!%p307_p3), 7424 }
   0xb   : > { %2043 = vmatpush3.bf16.msra.mxu0 (!%p307_p3), %v2268_v0  ;;  %2058 = vmatprep.mubr.msk.bf16.mxu0 (!%p307_p3), %vm2387_vm0, %v2386_v1  ;;  %v2273_v6 = vld [vmem:[%s2855_s3 + $0x10] sm:$0xff] (!%p307_p3)   ;;  %v2274_v7 = vld [vmem:[%s2855_s3 + $0x58] sm:$0xff] (!%p307_p3)   ;;  %v2276_v9 = vld [vmem:[%s2855_s3 + $0x60] sm:$0xff] (!%p307_p3)   ;;  %p392_p7 = scmp.lt.s32.totalorder (!%p307_p3), %s389_s13, 17  ;;  %vm689_vm2 = vcmask (!%p307_p3), 1046528   ;;  %p413_p9 = scmp.lt.s32.totalorder (!%p307_p3), %s2368_s24, 15 }
   0xc   : > { %2063 = vmatpush3.bf16.msra.mxu1 (!%p307_p3), %v2269_v2  ;;  %2044 = vmatprep.subr.bf16.mxu0 (!%p307_p3), %v2386_v1  ;;  %v2275_v8 = vld [vmem:[%s2855_s3 + $0x18] sm:$0xff] (!%p307_p3)   ;;  %v2277_v10 = vld [vmem:[%s2855_s3 + $0x20] sm:$0xff] (!%p307_p3)   ;;  %v2278_v13 = vld [vmem:[%s2855_s3 + $0x68] sm:$0xff] (!%p307_p3)  }
   0xd   : > { %2064 = vmatprep.subr.bf16.mxu1 (!%p307_p3), %v2386_v1  ;;  %2078 = vmatprep.mubr.msk.bf16.mxu1 (!%p307_p3), %vm2387_vm0, %v2386_v1  ;;  %v2279_v14 = vld [vmem:[%s2855_s3 + $0x28] sm:$0xff] (!%p307_p3)   ;;  %v2280_v16 = vld [vmem:[%s2855_s3 + $0x70] sm:$0xff] (!%p307_p3)   ;;  %v2282_v21 = vld [vmem:[%s2855_s3 + $0x78] sm:$0xff] (!%p307_p3)  }
   0xe   : > { %v2281_v20 = vld [vmem:[%s2855_s3 + $0x30] sm:$0xff] (!%p307_p3)   ;;  %v2283_v22 = vld [vmem:[%s2855_s3 + $0x38] sm:$0xff] (!%p307_p3)   ;;  %v2286_v26 = vld [vmem:[%s2855_s3 + $0x80] sm:$0xff] (!%p307_p3)  }
   0xf   : > { %2045 = vmatpush3.bf16.msra.mxu0 (!%p307_p3), %v2270_v3  ;;  %v2287_v27 = vld [vmem:[%s2855_s3 + $0xc0] sm:$0xff] (!%p307_p3)   ;;  %v2288_v28 = vld [vmem:[%s2855_s3 + $0x88] sm:$0xff] (!%p307_p3)   ;;  %v2290_v30 = vld [vmem:[%s2855_s3 + $0x90] sm:$0xff] (!%p307_p3)  }
  0x10   : > { %s2871_s25 = smov (!%p380_p5, %s2372_s25), 1  ;;  %2065 = vmatpush3.bf16.msra.mxu1 %v2271_v4  ;;  %2046 = vmatprep.subr.bf16.mxu0 %v2386_v1  ;;  %s2873_s13 = smov (!%p392_p7, %s389_s13), 17  ;;  %v2289_v29 = vld [vmem:[%s2855_s3 + $0xc8] sm:$0xff]   ;;  %v2291_v31 = vld [vmem:[%s2855_s3 + $0xd0] sm:$0xff]   ;;  %v2292_v32 = vld [vmem:[%s2855_s3 + $0x98] sm:$0xff]  }
  0x11   : > { %s383_s16 = scalar_select %p382_p6, %s2368_s24, 17  ;;  %2066 = vmatprep.subr.bf16.mxu1 %v2386_v1  ;;  %v2293_v33 = vld [vmem:[%s2855_s3 + $0xd8] sm:$0xff]   ;;  %v2294_v34 = vld [vmem:[%s2855_s3 + $0xa0] sm:$0xff]   ;;  %v2296_v36 = vld [vmem:[%s2855_s3 + $0xa8] sm:$0xff]  }
  0x12   : > { %s2492_s19 = smul.u32 54, %s2871_s25  ;;  %v2295_v35 = vld [vmem:[%s2855_s3 + $0xe0] sm:$0xff]   ;;  %v2297_v37 = vld [vmem:[%s2855_s3 + $0xe8] sm:$0xff]   ;;  %v2298_v38 = vld [vmem:[%s2855_s3 + $0xb0] sm:$0xff]   ;;  %s1748_s8 = sshll.u32 %s2871_s25, 5 }
  0x13   : > { %s2222_s22 = smul.u32 3, %s383_s16  ;;  %2047 = vmatpush3.bf16.msra.mxu0 %v2272_v5  ;;  %v2299_v39 = vld [vmem:[%s2855_s3 + $0xf0] sm:$0xff]   ;;  %v2300_v41 = vld [vmem:[%s2855_s3 + $0xb8] sm:$0xff]   ;;  %v2302_v44 = vld [vmem:[%s2855_s3 + $0x100] sm:$0xff]  }
  0x14   : > { %2067 = vmatpush3.bf16.msra.mxu1 %v2273_v6  ;;  %2048 = vmatprep.subr.bf16.mxu0 %v2386_v1  ;;  %s2224_s15 = smul.u32 3, %s2873_s13  ;;  %v2301_v43 = vld [vmem:[%s2855_s3 + $0xf8] sm:$0xff]   ;;  %v2304_v47 = vld [vmem:[%s2855_s3 + $0x140] sm:$0xff]   ;;  %v2305_v48 = vld [vmem:[%s2855_s3 + $0x108] sm:$0xff]  }
  0x15   : > { %s386_s23 = sadd.s32 %s2492_s19, %s2222_s22  ;;  %2068 = vmatprep.subr.bf16.mxu1 %v2386_v1  ;;  %v2306_v49 = vld [vmem:[%s2855_s3 + $0x148] sm:$0xff]   ;;  %v2307_v50 = vld [vmem:[%s2855_s3 + $0x110] sm:$0xff]   ;;  %v2309_v52 = vld [vmem:[%s2855_s3 + $0x118] sm:$0xff]  }
  0x16   : > { %s1744_s12 = sshll.u32 %s386_s23, 2  ;;  %s396_s21 = sadd.s32 %s2224_s15, %s2492_s19  ;;  %v2308_v51 = vld [vmem:[%s2855_s3 + $0x150] sm:$0xff]   ;;  %v2310_v53 = vld [vmem:[%s2855_s3 + $0x158] sm:$0xff]   ;;  %v2311_v54 = vld [vmem:[%s2855_s3 + $0x120] sm:$0xff]  }
  0x17   : > { %2049 = vmatpush3.bf16.msra.mxu0 %v2274_v7  ;;  %s388_s18 = scalar_lea.vmem %s2852_s0, %s1744_s12  ;;  %s1745_s9 = sshll.u32 %s396_s21, 2  ;;  %v2312_v55 = vld [vmem:[%s2855_s3 + $0x160] sm:$0xff]   ;;  %v2313_v56 = vld [vmem:[%s2855_s3 + $0x128] sm:$0xff]   ;;  %v2315_v60 = vld [vmem:[%s2855_s3 + $0x130] sm:$0xff]  }
  0x18   : > { %2069 = vmatpush3.bf16.msra.mxu1 %v2275_v8  ;;  %2050 = vmatprep.subr.bf16.mxu0 %v2386_v1  ;;  %v2520_v11 = vld [vmem:[%s388_s18] sm:$0xff]   ;;  %v2522_v12 = vld [vmem:[%s388_s18 + $0x8] ss:$0 sps:$4 sm:$0x11]   ;;  %s2568_s15 = scalar_lea.vmem %s2853_s1, %s1745_s9  ;;  %s400_s12 = sadd.s32 2, %s2368_s24  ;;  %v2316_v0 = vld [vmem:[%s2855_s3 + $0x170] sm:$0xff]  }
  0x19   : > { %2070 = vmatprep.subr.bf16.mxu1 %v2386_v1  ;;  %v483_v15 = vshll.u32 %v2520_v11, 16  ;;  %v481_v17 = vshrl.u32 %v2520_v11, 16  ;;  %v488_v19 = vshll.u32 %v2522_v12, 16  ;;  %p403_p8 = scmp.lt.s32.totalorder %s400_s12, 17  ;;  %v690_v40 = vrot.slane %v2520_v11, 1  ;;  %v2636_v46 = vld [vmem:[%s2568_s15] sm:$0xff]  }
  0x1a   : > { %v691_v42 = vrot.slane %v2522_v12, 1  ;;  %v2319_v57 = vld [vmem:[%s2568_s15 + $0x8] ss:$0 sps:$4 sm:$0x11]   ;;  %v925_v58 = vshll.u32 %v2636_v46, 16  ;;  %v923_v61 = vshrl.u32 %v2636_v46, 16 }
  0x1b   : > { %2051 = vmatpush3.bf16.msra.mxu0 %v2276_v9  ;;  %v485_v18 = vrot.slane %v483_v15, 1  ;;  %v490_v24 = vrot.slane %v488_v19, 1  ;;  %s2875_s12 = smov (!%p403_p8, %s400_s12), 17  ;;  %v2314_v59 = vld [vmem:[%s2855_s3 + $0x168] sm:$0xff]   ;;  %v930_v63 = vshll.u32 %v2319_v57, 16  ;;  %v2317_v2 = vld [vmem:[%s2855_s3 + $0x138] sm:$0xff]  }
  0x1c   : > { %2071 = vmatpush3.bf16.msra.mxu1 %v2277_v10  ;;  %2052 = vmatprep.subr.bf16.mxu0 %v2386_v1  ;;  %s2225_s9 = smul.u32 3, %s2875_s12  ;;  %v692_v45 = vsel %vm689_vm2, %v690_v40, %v691_v42  ;;  %v927_v62 = vrot.slane %v925_v58, 1  ;;  %v2318_v5 = vld [vmem:[%s2855_s3 + $0x178] sm:$0xff]   ;;  %v1043_v6 = vrot.slane %v2636_v46, 1  ;;  %v1044_v7 = vrot.slane %v2319_v57, 1  ;;  %v2320_v9 = vld [vmem:[%s2855_s3 + $0x180] sm:$0xff]  }
  0x1d   : > { %2072 = vmatprep.subr.bf16.mxu1 %v2386_v1  ;;  %v486_v23 = vor.u32 %v485_v18, %v481_v17  ;;  %v932_v4 = vrot.slane %v930_v63, 1  ;;  %v2322_v12 = vld [vmem:[%s2855_s3 + $0x188] sm:$0xff]   ;;  %v2325_v15 = vld [vmem:[%s2855_s3 + $0x1d0] sm:$0xff]   ;;  %v2327_v17 = vld [vmem:[%s2855_s3 + $0x1d8] sm:$0xff]   ;;  %s2877_s24 = smov (!%p413_p9, %s2368_s24), 15 }
  0x1e   : > { %s407_s12 = sadd.s32 %s2225_s9, %s2492_s19  ;;  %v928_v3 = vor.u32 %v927_v62, %v923_v61  ;;  %v1045_v10 = vsel %vm689_vm2, %v1043_v6, %v1044_v7  ;;  %v2328_v18 = vld [vmem:[%s2855_s3 + $0x1a0] sm:$0xff]   ;;  %v2343_v40 = vld [vmem:[%s2855_s3 + $0x228] sm:$0xff]   ;;  %v2345_v42 = vld [vmem:[%s2855_s3 + $0x238] sm:$0xff]   ;;  %s1747_s23 = sshll.u32 %s2877_s24, 1 }
  0x1f   : > { %2053 = vmatpush3.bf16.msra.mxu0 %v2278_v13  ;;  %v491_v25 = vsel %vm479_vm1, %v486_v23, %v490_v24  ;;  %s1746_s13 = sshll.u32 %s407_s12, 2  ;;  %v2323_v13 = vld [vmem:[%s2855_s3 + $0x1c8] sm:$0xff]   ;;  %v2329_v19 = vld [vmem:[%s2855_s3 + $0x1e0] sm:$0xff]   ;;  %s417_s9 = sadd.s32 %s1748_s8, %s1747_s23 }
  0x20   : > { %2073 = vmatpush3.bf16.msra.mxu1 %v2279_v14  ;;  %2054 = vmatprep.subr.bf16.mxu0 %v2386_v1  ;;  %s2654_s11 = scalar_lea.vmem %s2854_s2, %s1746_s13  ;;  %v933_v8 = vsel %vm479_vm1, %v928_v3, %v932_v4  ;;  %v2324_v14 = vld [vmem:[%s2855_s3 + $0x190] sm:$0xff]   ;;  %s1749_s10 = sshll.u32 %s417_s9, 3 }
  0x21   : > { %2074 = vmatprep.subr.bf16.mxu1 %v2386_v1  ;;  %v2338_v23 = vld [vmem:[%s2654_s11 + $0x8] ss:$0 sps:$4 sm:$0x11]   ;;  %s419_s15 = scalar_lea.vmem %s2857_s5, %s1749_s10  ;;  %s1750_s12 = sshll.u32 %s2871_s25, 4 }
  0x22   : > { %s425_s20 = sadd.s32 %s1750_s12, %s2877_s24 }
  0x23   : > { %2055 = vmatpush3.bf16.msra.mxu0 %v2280_v16  ;;  %v2326_v16 = vld [vmem:[%s2855_s3 + $0x198] sm:$0xff]   ;;  %s426_s13 = scalar_lea.vmem %s2858_s6, %s425_s20  ;;  %s433_s23 = scalar_lea.vmem %s2859_s7, %s425_s20 }
  0x24   : > { %2075 = vmatpush3.bf16.msra.mxu1 %v2281_v20  ;;  %2056 = vmatprep.subr.bf16.mxu0 %v2386_v1  ;;  %v2336_v20 = vld [vmem:[%s2654_s11] sm:$0xff]  }
  0x25   : > { %2076 = vmatprep.subr.bf16.mxu1 %v2386_v1  ;;  %v1278_v24 = vshll.u32 %v2336_v20, 16 }
  0x27   : > { %2057 = vmatpush3.bf16.msra.mxu0 %v2282_v21  ;;  %v2330_v21 = vld [vmem:[%s2855_s3 + $0x1a8] sm:$0xff]  }
  0x28   : > { %2077 = vmatpush3.bf16.msra.mxu1 %v2283_v22  ;;  %2082 = vmatprep.subr.bf16.mxu0 %v2386_v1  ;;  %v2331_v22 = vld [vmem:[%s2855_s3 + $0x1e8] sm:$0xff]  }
  0x29   : > { %2102 = vmatprep.subr.bf16.mxu1 %v2386_v1 }
  0x2a   : > { %2059 = vmatmul.mubr.bf16.vlgmr.msra.gmra.mrb[0].mxu0 %v491_v25  ;;  %v2332_v25 = vld [vmem:[%s2855_s3 + $0x1b0] sm:$0xff]  }
  0x2b   : > { %2079 = vmatmul.mubr.bf16.vlgmr.msra.gmra.mrb[0].mxu1 %v2520_v11  ;;  %2083 = vmatpush3.bf16.msra.mxu0 %v2286_v26  ;;  %v2321_v11 = vld [vmem:[%s2855_s3 + $0x1c0] sm:$0xff]   ;;  %v2333_v26 = vld [vmem:[%s2855_s3 + $0x1f0] sm:$0xff]  }
  0x2c   : > { %2103 = vmatpush3.bf16.msra.mxu1 %v2287_v27  ;;  %2084 = vmatprep.subr.bf16.mxu0 %v2386_v1  ;;  %v1276_v27 = vshrl.u32 %v2336_v20, 16 }
  0x2d   : > { %2104 = vmatprep.subr.bf16.mxu1 %v2386_v1  ;;  %2098 = vmatprep.mubr.msk.bf16.mxu0 %vm2387_vm0, %v2386_v1 }
  0x2e   : > { %2118 = vmatprep.mubr.msk.bf16.mxu1 %vm2387_vm0, %v2386_v1 }
  0x2f   : > { %2085 = vmatpush3.bf16.msra.mxu0 %v2288_v28  ;;  %v1280_v28 = vrot.slane %v1278_v24, 1 }
  0x30   : > { %2105 = vmatpush3.bf16.msra.mxu1 %v2289_v29  ;;  %2086 = vmatprep.subr.bf16.mxu0 %v2386_v1  ;;  %v1283_v29 = vshll.u32 %v2338_v23, 16 }
  0x31   : > { %2106 = vmatprep.subr.bf16.mxu1 %v2386_v1 }
  0x33   : > { %2087 = vmatpush3.bf16.msra.mxu0 %v2290_v30  ;;  %v2334_v30 = vld [vmem:[%s2855_s3 + $0x1b8] sm:$0xff]  }
  0x34   : > { %2107 = vmatpush3.bf16.msra.mxu1 %v2291_v31  ;;  %2088 = vmatprep.subr.bf16.mxu0 %v2386_v1  ;;  %v2335_v31 = vld [vmem:[%s2855_s3 + $0x1f8] sm:$0xff]  }
  0x35   : > { %2108 = vmatprep.subr.bf16.mxu1 %v2386_v1 }
  0x37   : > { %2089 = vmatpush3.bf16.msra.mxu0 %v2292_v32  ;;  %v1281_v32 = vor.u32 %v1280_v28, %v1276_v27 }
  0x38   : > { %2109 = vmatpush3.bf16.msra.mxu1 %v2293_v33  ;;  %2090 = vmatprep.subr.bf16.mxu0 %v2386_v1  ;;  %v1285_v33 = vrot.slane %v1283_v29, 1  ;;  %v1958_v29 = vld [vmem:[%s2856_s4] ss:$0 sm:$0xff] }
  0x39   : > { %2110 = vmatprep.subr.bf16.mxu1 %v2386_v1 }
  0x3b   : > { %2091 = vmatpush3.bf16.msra.mxu0 %v2294_v34  ;;  %v2337_v34 = vld [vmem:[%s2855_s3 + $0x200] sm:$0xff]  }
  0x3c   : > { %2111 = vmatpush3.bf16.msra.mxu1 %v2295_v35  ;;  %2092 = vmatprep.subr.bf16.mxu0 %v2386_v1  ;;  %v1286_v35 = vsel %vm479_vm1, %v1281_v32, %v1285_v33 }
  0x3d   : > { %2112 = vmatprep.subr.bf16.mxu1 %v2386_v1 }
  0x3f   : > { %2093 = vmatpush3.bf16.msra.mxu0 %v2296_v36  ;;  %v2339_v36 = vld [vmem:[%s2855_s3 + $0x208] sm:$0xff]  }
  0x40   : > { %2113 = vmatpush3.bf16.msra.mxu1 %v2297_v37  ;;  %2094 = vmatprep.subr.bf16.mxu0 %v2386_v1  ;;  %v2340_v37 = vld [vmem:[%s2855_s3 + $0x210] sm:$0xff]  }
  0x41   : > { %2114 = vmatprep.subr.bf16.mxu1 %v2386_v1 }
  0x43   : > { %2095 = vmatpush3.bf16.msra.mxu0 %v2298_v38  ;;  %v2341_v38 = vld [vmem:[%s2855_s3 + $0x218] sm:$0xff]  }
  0x44   : > { %2115 = vmatpush3.bf16.msra.mxu1 %v2299_v39  ;;  %2096 = vmatprep.subr.bf16.mxu0 %v2386_v1  ;;  %v2342_v39 = vld [vmem:[%s2855_s3 + $0x220] sm:$0xff]  }
  0x45   : > { %2116 = vmatprep.subr.bf16.mxu1 %v2386_v1 }
  0x47   : > { %2097 = vmatpush3.bf16.msra.mxu0 %v2300_v41  ;;  %v2344_v41 = vld [vmem:[%s2855_s3 + $0x230] sm:$0xff]  }
  0x48   : > { %2117 = vmatpush3.bf16.msra.mxu1 %v2301_v43  ;;  %2122 = vmatprep.subr.bf16.mxu0 %v2386_v1  ;;  %v1396_v43 = vrot.slane %v2336_v20, 1 }
  0x49   : > { %2142 = vmatprep.subr.bf16.mxu1 %v2386_v1 }
  0x4a   : > { %2099 = vmatmul.mubr.bf16.vlgmr.msra.gmra.mrb[4].mxu0 %v692_v45 }
  0x4b   : > { %2123 = vmatpush3.bf16.msra.mxu0 %v2302_v44  ;;  %2119 = vmatmul.mubr.bf16.vlgmr.msra.gmra.mrb[4].mxu1 %v2636_v46  ;;  %v1397_v44 = vrot.slane %v2338_v23, 1 }
  0x4c   : > { %2143 = vmatpush3.bf16.msra.mxu1 %v2304_v47  ;;  %2124 = vmatprep.subr.bf16.mxu0 %v2386_v1 }
  0x4d   : > { %2144 = vmatprep.subr.bf16.mxu1 %v2386_v1  ;;  %2138 = vmatprep.mubr.msk.bf16.mxu0 %vm2387_vm0, %v2386_v1  ;;  %v1398_v45 = vsel %vm689_vm2, %v1396_v43, %v1397_v44 }
  0x4e   : > { %2158 = vmatprep.mubr.msk.bf16.mxu1 %vm2387_vm0, %v2386_v1 }
  0x4f   : > { %2125 = vmatpush3.bf16.msra.mxu0 %v2305_v48 }
  0x50   : > { %2145 = vmatpush3.bf16.msra.mxu1 %v2306_v49  ;;  %2126 = vmatprep.subr.bf16.mxu0 %v2386_v1 }
  0x51   : > { %2146 = vmatprep.subr.bf16.mxu1 %v2386_v1 }
  0x53   : > { %2127 = vmatpush3.bf16.msra.mxu0 %v2307_v50 }
  0x54   : > { %2147 = vmatpush3.bf16.msra.mxu1 %v2308_v51  ;;  %2128 = vmatprep.subr.bf16.mxu0 %v2386_v1 }
  0x55   : > { %2148 = vmatprep.subr.bf16.mxu1 %v2386_v1 }
  0x57   : > { %2129 = vmatpush3.bf16.msra.mxu0 %v2309_v52 }
  0x58   : > { %2149 = vmatpush3.bf16.msra.mxu1 %v2310_v53  ;;  %2130 = vmatprep.subr.bf16.mxu0 %v2386_v1 }
  0x59   : > { %2150 = vmatprep.subr.bf16.mxu1 %v2386_v1 }
  0x5b   : > { %2131 = vmatpush3.bf16.msra.mxu0 %v2311_v54 }
  0x5c   : > { %2151 = vmatpush3.bf16.msra.mxu1 %v2312_v55  ;;  %2132 = vmatprep.subr.bf16.mxu0 %v2386_v1 }
  0x5d   : > { %2152 = vmatprep.subr.bf16.mxu1 %v2386_v1 }
  0x5f   : > { %2133 = vmatpush3.bf16.msra.mxu0 %v2313_v56 }
  0x60   : > { %2153 = vmatpush3.bf16.msra.mxu1 %v2314_v59  ;;  %2134 = vmatprep.subr.bf16.mxu0 %v2386_v1 }
  0x61   : > { %2154 = vmatprep.subr.bf16.mxu1 %v2386_v1 }
  0x63   : > { %2135 = vmatpush3.bf16.msra.mxu0 %v2315_v60 }
  0x64   : > { %2155 = vmatpush3.bf16.msra.mxu1 %v2316_v0  ;;  %2136 = vmatprep.subr.bf16.mxu0 %v2386_v1 }
  0x65   : > { %2156 = vmatprep.subr.bf16.mxu1 %v2386_v1 }
  0x67   : > { %2137 = vmatpush3.bf16.msra.mxu0 %v2317_v2 }
  0x68   : > { %2157 = vmatpush3.bf16.msra.mxu1 %v2318_v5  ;;  %2162 = vmatprep.subr.bf16.mxu0 %v2386_v1 }
  0x69   : > { %2182 = vmatprep.subr.bf16.mxu1 %v2386_v1 }
  0x6a   : > { %2139 = vmatmul.mubr.bf16.vlgmr.msra.gmra.mrb[8].mxu0 %v933_v8 }
  0x6b   : > { %2163 = vmatpush3.bf16.msra.mxu0 %v2320_v9  ;;  %2159 = vmatmul.mubr.bf16.vlgmr.msra.gmra.mrb[8].mxu1 %v1045_v10 }
  0x6c   : > { %2183 = vmatpush3.bf16.msra.mxu1 %v2321_v11  ;;  %2164 = vmatprep.subr.bf16.mxu0 %v2386_v1 }
  0x6d   : > { %2184 = vmatprep.subr.bf16.mxu1 %v2386_v1  ;;  %2178 = vmatprep.mubr.msk.bf16.mxu0 %vm2387_vm0, %v2386_v1 }
  0x6e   : > { %2198 = vmatprep.mubr.msk.bf16.mxu1 %vm2387_vm0, %v2386_v1 }
  0x6f   : > { %2165 = vmatpush3.bf16.msra.mxu0 %v2322_v12 }
  0x70   : > { %2185 = vmatpush3.bf16.msra.mxu1 %v2323_v13  ;;  %2166 = vmatprep.subr.bf16.mxu0 %v2386_v1 }
  0x71   : > { %2186 = vmatprep.subr.bf16.mxu1 %v2386_v1 }
  0x73   : > { %2167 = vmatpush3.bf16.msra.mxu0 %v2324_v14 }
  0x74   : > { %2187 = vmatpush3.bf16.msra.mxu1 %v2325_v15  ;;  %2168 = vmatprep.subr.bf16.mxu0 %v2386_v1 }
  0x75   : > { %2188 = vmatprep.subr.bf16.mxu1 %v2386_v1 }
  0x77   : > { %2169 = vmatpush3.bf16.msra.mxu0 %v2326_v16 }
  0x78   : > { %2189 = vmatpush3.bf16.msra.mxu1 %v2327_v17  ;;  %2170 = vmatprep.subr.bf16.mxu0 %v2386_v1 }
  0x79   : > { %2190 = vmatprep.subr.bf16.mxu1 %v2386_v1 }
  0x7b   : > { %2171 = vmatpush3.bf16.msra.mxu0 %v2328_v18 }
  0x7c   : > { %2191 = vmatpush3.bf16.msra.mxu1 %v2329_v19  ;;  %2172 = vmatprep.subr.bf16.mxu0 %v2386_v1 }
  0x7d   : > { %2192 = vmatprep.subr.bf16.mxu1 %v2386_v1 }
  0x7f   : > { %2173 = vmatpush3.bf16.msra.mxu0 %v2330_v21 }
  0x80   : > { %2193 = vmatpush3.bf16.msra.mxu1 %v2331_v22  ;;  %2174 = vmatprep.subr.bf16.mxu0 %v2386_v1 }
  0x81   : > { %2194 = vmatprep.subr.bf16.mxu1 %v2386_v1 }
  0x83   : > { %2175 = vmatpush3.bf16.msra.mxu0 %v2332_v25 }
  0x84   : > { %2195 = vmatpush3.bf16.msra.mxu1 %v2333_v26  ;;  %2176 = vmatprep.subr.bf16.mxu0 %v2386_v1 }
  0x85   : > { %2196 = vmatprep.subr.bf16.mxu1 %v2386_v1 }
  0x87   : > { %2177 = vmatpush3.bf16.msra.mxu0 %v2334_v30 }
  0x88   : > { %2197 = vmatpush3.bf16.msra.mxu1 %v2335_v31  ;;  %2202 = vmatprep.subr.bf16.mxu0 %v2386_v1 }
  0x8a   : > { %2179 = vmatmul.mubr.bf16.vlgmr.msra.gmra.mrb[12].mxu0 %v2336_v20 }
  0x8b   : > { %2203 = vmatpush3.bf16.msra.mxu0 %v2337_v34  ;;  %2199 = vmatmul.mubr.bf16.vlgmr.msra.gmra.mrb[12].mxu1 %v1286_v35 }
  0x8c   : > { %2204 = vmatprep.subr.bf16.mxu0 %v2386_v1  ;;  %2218 = vmatprep.mubr.msk.bf16.mxu0 %vm2387_vm0, %v2386_v1 }
  0x8f   : > { %2205 = vmatpush3.bf16.msra.mxu0 %v2339_v36 }
  0x90   : > { %2206 = vmatprep.subr.bf16.mxu0 %v2386_v1 }
  0x93   : > { %2207 = vmatpush3.bf16.msra.mxu0 %v2340_v37 }
  0x94   : > { %2208 = vmatprep.subr.bf16.mxu0 %v2386_v1 }
  0x97   : > { %2209 = vmatpush3.bf16.msra.mxu0 %v2341_v38 }
  0x98   : > { %2210 = vmatprep.subr.bf16.mxu0 %v2386_v1 }
  0x9b   : > { %2211 = vmatpush3.bf16.msra.mxu0 %v2342_v39 }
  0x9c   : > { %2212 = vmatprep.subr.bf16.mxu0 %v2386_v1 }
  0x9f   : > { %2213 = vmatpush3.bf16.msra.mxu0 %v2343_v40 }
  0xa0   : > { %2214 = vmatprep.subr.bf16.mxu0 %v2386_v1 }
  0xa3   : > { %2215 = vmatpush3.bf16.msra.mxu0 %v2344_v41 }
  0xa4   : > { %2216 = vmatprep.subr.bf16.mxu0 %v2386_v1 }
  0xa7   : > { %2217 = vmatpush3.bf16.msra.mxu0 %v2345_v42 }
  0xaa   : > { %2219 = vmatmul.mubr.bf16.vlgmr.msra.gmra.mrb[16].mxu0 %v1398_v45 }
  0xfd   : > { %v575_v46 = vpop.f32.mrb[0].mxu0 }
  0xfe   : > { %v665_v47 = vpop.f32.mrb[0].mxu1  ;;  %v2060_v48 = vpop.f32.mrb[1].mxu0 }
  0xff   : > { %v666_v49 = vadd.f32 %v665_v47, %v575_v46  ;;  %v2080_v50 = vpop.f32.mrb[1].mxu1  ;;  %v578_v51 = vpop.f32.mrb[2].mxu0 }
 0x100   : > { %v668_v52 = vpop.f32.mrb[2].mxu1  ;;  %v2061_v53 = vpop.f32.mrb[3].mxu0 }
 0x101   : > { %v669_v54 = vadd.f32 %v668_v52, %v578_v51  ;;  %v2081_v55 = vpop.f32.mrb[3].mxu1 }
 0x11d   : > { %v776_v56 = vpop.f32.mrb[4].mxu0 }
 0x11e   : > { %v783_v57 = vadd.f32 %v776_v56, %v666_v49  ;;  %v2100_v58 = vpop.f32.mrb[5].mxu0  ;;  %v893_v59 = vpop.f32.mrb[4].mxu1 }
 0x11f   : > { %v779_v60 = vpop.f32.mrb[6].mxu0  ;;  %v2120_v1 = vpop.f32.mrb[5].mxu1 }
 0x120   : > { %v784_v61 = vadd.f32 %v779_v60, %v669_v54  ;;  %v900_v62 = vadd.f32 %v893_v59, %v783_v57  ;;  %v2101_v63 = vpop.f32.mrb[7].mxu0  ;;  %v896_v0 = vpop.f32.mrb[6].mxu1 }
 0x121   : > { %v2121_v2 = vpop.f32.mrb[7].mxu1 }
 0x122   : > { %v901_v3 = vadd.f32 %v896_v0, %v784_v61 }
 0x13d   : > { %v1017_v4 = vpop.f32.mrb[8].mxu0 }
 0x13e   : > { %v1024_v5 = vadd.f32 %v1017_v4, %v900_v62  ;;  %v2140_v6 = vpop.f32.mrb[9].mxu0  ;;  %v1129_v7 = vpop.f32.mrb[8].mxu1 }
 0x13f   : > { %v1020_v8 = vpop.f32.mrb[10].mxu0  ;;  %v2160_v9 = vpop.f32.mrb[9].mxu1 }
 0x140   : > { %v1025_v10 = vadd.f32 %v1020_v8, %v901_v3  ;;  %v1136_v11 = vadd.f32 %v1129_v7, %v1024_v5  ;;  %v2141_v12 = vpop.f32.mrb[11].mxu0  ;;  %v1132_v13 = vpop.f32.mrb[10].mxu1 }
 0x141   : > { %v2161_v14 = vpop.f32.mrb[11].mxu1 }
 0x142   : > { %v1137_v15 = vadd.f32 %v1132_v13, %v1025_v10 }
 0x15d   : > { %v1246_v16 = vpop.f32.mrb[12].mxu0 }
 0x15e   : > { %v1253_v17 = vadd.f32 %v1246_v16, %v1136_v11  ;;  %v2180_v18 = vpop.f32.mrb[13].mxu0  ;;  %v1370_v19 = vpop.f32.mrb[12].mxu1 }
 0x15f   : > { %v1249_v20 = vpop.f32.mrb[14].mxu0  ;;  %v2200_v21 = vpop.f32.mrb[13].mxu1 }
 0x160   : > { %v1254_v22 = vadd.f32 %v1249_v20, %v1137_v15  ;;  %v1377_v23 = vadd.f32 %v1370_v19, %v1253_v17  ;;  %v2181_v24 = vpop.f32.mrb[15].mxu0  ;;  %v1373_v25 = vpop.f32.mrb[14].mxu1 }
 0x161   : > { %v2201_v26 = vpop.f32.mrb[15].mxu1 }
 0x162   : > { %v1378_v27 = vadd.f32 %v1373_v25, %v1254_v22 }
 0x17d   : > { %v1482_v28 = vpop.f32.mrb[16].mxu0 }
 0x17e   : > { %v1489_v30 = vadd.f32 %v1482_v28, %v1377_v23  ;;  %v2220_v31 = vpop.f32.mrb[17].mxu0 }
 0x17f   : > { %v1485_v32 = vpop.f32.mrb[18].mxu0 }
 0x180   : > { %v1498_v33 = vadd.f32 %v1958_v29, %v1489_v30  ;;  %v1490_v34 = vadd.f32 %v1485_v32, %v1378_v27  ;;  %v2221_v35 = vpop.f32.mrb[19].mxu0 }
 0x182   : > { %1500 = vst [vmem:[%s419_s15] sm:$0xff] %v1498_v33  ;;  %v1499_v36 = vadd.f32 %v1958_v29, %v1490_v34  ;;  %v1510_v37 = vmul.f32 %v1498_v33, %v1498_v33 }
 0x184   : > { %1501 = vst [vmem:[%s419_s15 + $0x8] sm:$0xff] %v1499_v36  ;;  %v1502_v38 = vadd.f32 %v1499_v36, %v1498_v33  ;;  %v1511_v39 = vmul.f32 %v1499_v36, %v1499_v36 }
 0x186   : > { %v1503_v40 = vrot.slane %v1502_v38, 4  ;;  %v1512_v41 = vadd.f32 %v1511_v39, %v1510_v37 }
 0x188   : > { %v1504_v42 = vadd.f32 %v1503_v40, %v1502_v38  ;;  %v1513_v43 = vrot.slane %v1512_v41, 4 }
 0x18a   : > { %v1505_v44 = vrot.slane %v1504_v42, 2  ;;  %v1514_v45 = vadd.f32 %v1513_v43, %v1512_v41 }
 0x18c   : > { %v1506_v46 = vadd.f32 %v1505_v44, %v1504_v42  ;;  %v1515_v47 = vrot.slane %v1514_v45, 2 }
 0x18e   : > { %v1507_v48 = vrot.slane %v1506_v46, 1  ;;  %v1516_v49 = vadd.f32 %v1515_v47, %v1514_v45 }
 0x190   : > { %v1508_v50 = vadd.f32 %v1507_v48, %v1506_v46  ;;  %v1517_v51 = vrot.slane %v1516_v49, 1 }
 0x192   : > { %1509 = vst [vmem:[%s426_s13] sm:$0x1] %v1508_v50  ;;  %v1518_v52 = vadd.f32 %v1517_v51, %v1516_v49 }
 0x194   : > { %1519 = vst [vmem:[%s433_s23] sm:$0x1] %v1518_v52 }
 0x195 PF: > { %s18_s28 = sadd.s32 1, %s2384_s28   ;;  %s2860_s24 = smov %s2376_s26 }
 0x196   : > { %p15_p10 = scmp.ge.s32.totalorder %s18_s28, 34   ;;  %s2861_s25 = smov %s2380_s27 }
 0x197   : > { %s2862_s26 = smov %s2865_s29  ;;  %s2863_s27 = smov %s2869_s30 }
 0x198   :  { %17 = sbr.rel (!%p15_p10) target bundleno = 3 (0x3), region = 108 }

// kernel: unet_encoder_block.7
= control target key start
LH: loop header
LB: loop body
LE: loop exit
PB: predicated region body
PF: predicated region fallthrough
CT: control target
= control target key end

     0   :  { %s1764_s0 = inlined_call_operand.vmem [shape: f32[16,2,16,128], index: 0, kind: input, shape index: {}]   ;;  %s1765_s1 = inlined_call_operand.vmem [shape: f32[1,128], index: 1, kind: input, shape index: {}]   ;;  %s1766_s2 = inlined_call_operand.vmem [shape: f32[1,128], index: 2, kind: input, shape index: {}]   ;;  %s1767_s3 = inlined_call_operand.vmem [shape: f32[16,2,16,128], index: 3, kind: output, shape index: {0}]   ;;  %s1768_s4 = inlined_call_operand.vmem [shape: f32[16,8,128], index: 4, kind: output, shape index: {1}]  }
   0x1   :  { %v867_v0 = vld [vmem:[%s1765_s1] ss:$0 sm:$0xff]  ;;  %v19_v4 = vld [vmem:[%s1764_s0 + $0x8] sm:$0xff]  ;;  %v20_v5 = vld [vmem:[%s1764_s0 + $0x10] sm:$0xff] }
   0x2   :  { %v872_v1 = vld [vmem:[%s1766_s2] ss:$0 sm:$0xff]  ;;  %v21_v6 = vld [vmem:[%s1764_s0 + $0x18] sm:$0xff]  ;;  %v89_v7 = vmul.f32 %v867_v0, %v19_v4  ;;  %v90_v8 = vmul.f32 %v867_v0, %v20_v5  ;;  %v23_v11 = vld [vmem:[%s1764_s0 + $0x28] sm:$0xff] }
   0x3   :  { %v18_v2 = vld [vmem:[%s1764_s0] sm:$0xff]  ;;  %v91_v9 = vmul.f32 %v867_v0, %v21_v6  ;;  %v24_v12 = vld [vmem:[%s1764_s0 + $0x30] sm:$0xff]  ;;  %v93_v15 = vmul.f32 %v867_v0, %v23_v11  ;;  %v25_v17 = vld [vmem:[%s1764_s0 + $0x38] sm:$0xff] }
   0x4   :  { %v88_v3 = vmul.f32 %v867_v0, %v18_v2  ;;  %v22_v10 = vld [vmem:[%s1764_s0 + $0x20] sm:$0xff]  ;;  %v94_v16 = vmul.f32 %v867_v0, %v24_v12  ;;  %v159_v18 = vadd.f32 %v872_v1, %v89_v7  ;;  %v160_v19 = vadd.f32 %v872_v1, %v90_v8  ;;  %v27_v27 = vld [vmem:[%s1764_s0 + $0x48] sm:$0xff]  ;;  %v28_v28 = vld [vmem:[%s1764_s0 + $0x50] sm:$0xff] }
   0x5   :  { %v92_v14 = vmul.f32 %v867_v0, %v22_v10  ;;  %v161_v20 = vadd.f32 %v872_v1, %v91_v9  ;;  %v95_v21 = vmul.f32 %v867_v0, %v25_v17  ;;  %v26_v22 = vld [vmem:[%s1764_s0 + $0x40] sm:$0xff]  ;;  %v163_v25 = vadd.f32 %v872_v1, %v93_v15  ;;  %v29_v29 = vld [vmem:[%s1764_s0 + $0x58] sm:$0xff]  ;;  %v31_v35 = vld [vmem:[%s1764_s0 + $0x68] sm:$0xff] }
   0x6   :  { %v158_v13 = vadd.f32 %v872_v1, %v88_v3  ;;  %v164_v26 = vadd.f32 %v872_v1, %v94_v16  ;;  %v223_v30 = vmax.f32 %v159_v18, 0.0  ;;  %v224_v31 = vmax.f32 %v160_v19, 0.0  ;;  %v30_v34 = vld [vmem:[%s1764_s0 + $0x60] sm:$0xff]  ;;  %v32_v36 = vld [vmem:[%s1764_s0 + $0x70] sm:$0xff]  ;;  %v33_v41 = vld [vmem:[%s1764_s0 + $0x78] sm:$0xff] }
   0x7   :  { %v162_v24 = vadd.f32 %v872_v1, %v92_v14  ;;  %v225_v32 = vmax.f32 %v161_v20, 0.0  ;;  %v165_v33 = vadd.f32 %v872_v1, %v95_v21  ;;  %v227_v38 = vmax.f32 %v163_v25, 0.0  ;;  %v34_v54 = vld [vmem:[%s1764_s0 + $0x80] sm:$0xff]  ;;  %v35_v59 = vld [vmem:[%s1764_s0 + $0x88] sm:$0xff]  ;;  %v36_v60 = vld [vmem:[%s1764_s0 + $0x90] sm:$0xff] }
   0x8   :  { %v222_v23 = vmax.f32 %v158_v13, 0.0  ;;  %v228_v39 = vmax.f32 %v164_v26, 0.0  ;;  %v96_v40 = vmul.f32 %v867_v0, %v26_v22  ;;  %287 = vst [vmem:[%s1767_s3 + $0x8] sm:$0xff] %v223_v30  ;;  %288 = vst [vmem:[%s1767_s3 + $0x10] sm:$0xff] %v224_v31  ;;  %v97_v43 = vmul.f32 %v867_v0, %v27_v27  ;;  %v37_v61 = vld [vmem:[%s1764_s0 + $0x98] sm:$0xff]  ;;  %v38_v4 = vld [vmem:[%s1764_s0 + $0xa0] sm:$0xff] }
   0x9   :  { %v226_v37 = vmax.f32 %v162_v24, 0.0  ;;  %289 = vst [vmem:[%s1767_s3 + $0x18] sm:$0xff] %v225_v32  ;;  %v229_v42 = vmax.f32 %v165_v33, 0.0  ;;  %v98_v44 = vmul.f32 %v867_v0, %v28_v28  ;;  %v99_v45 = vmul.f32 %v867_v0, %v29_v29  ;;  %291 = vst [vmem:[%s1767_s3 + $0x28] sm:$0xff] %v227_v38  ;;  %v39_v5 = vld [vmem:[%s1764_s0 + $0xa8] sm:$0xff]  ;;  %v40_v6 = vld [vmem:[%s1764_s0 + $0xb0] sm:$0xff] }
   0xa   :  { %286 = vst [vmem:[%s1767_s3] sm:$0xff] %v222_v23  ;;  %292 = vst [vmem:[%s1767_s3 + $0x30] sm:$0xff] %v228_v39  ;;  %v166_v46 = vadd.f32 %v872_v1, %v96_v40  ;;  %v100_v47 = vmul.f32 %v867_v0, %v30_v34  ;;  %v101_v48 = vmul.f32 %v867_v0, %v31_v35  ;;  %v41_v11 = vld [vmem:[%s1764_s0 + $0xb8] sm:$0xff]  ;;  %v42_v24 = vld [vmem:[%s1764_s0 + $0xc0] sm:$0xff] }
   0xb   :  { %290 = vst [vmem:[%s1767_s3 + $0x20] sm:$0xff] %v226_v37  ;;  %v102_v49 = vmul.f32 %v867_v0, %v32_v36  ;;  %293 = vst [vmem:[%s1767_s3 + $0x38] sm:$0xff] %v229_v42  ;;  %v167_v50 = vadd.f32 %v872_v1, %v97_v43  ;;  %v168_v51 = vadd.f32 %v872_v1, %v98_v44  ;;  %v43_v29 = vld [vmem:[%s1764_s0 + $0xc8] sm:$0xff]  ;;  %v44_v30 = vld [vmem:[%s1764_s0 + $0xd0] sm:$0xff] }
   0xc   :  { %v169_v52 = vadd.f32 %v872_v1, %v99_v45  ;;  %v103_v53 = vmul.f32 %v867_v0, %v33_v41  ;;  %v230_v55 = vmax.f32 %v166_v46, 0.0  ;;  %v170_v56 = vadd.f32 %v872_v1, %v100_v47  ;;  %v45_v31 = vld [vmem:[%s1764_s0 + $0xd8] sm:$0xff]  ;;  %v46_v36 = vld [vmem:[%s1764_s0 + $0xe0] sm:$0xff]  ;;  %v47_v37 = vld [vmem:[%s1764_s0 + $0xe8] sm:$0xff] }
   0xd   :  { %v171_v57 = vadd.f32 %v872_v1, %v101_v48  ;;  %v172_v58 = vadd.f32 %v872_v1, %v102_v49  ;;  %v231_v62 = vmax.f32 %v167_v50, 0.0  ;;  %v232_v63 = vmax.f32 %v168_v51, 0.0  ;;  %v48_v38 = vld [vmem:[%s1764_s0 + $0xf0] sm:$0xff]  ;;  %v49_v43 = vld [vmem:[%s1764_s0 + $0xf8] sm:$0xff] }
   0xe   :  { %v233_v2 = vmax.f32 %v169_v52, 0.0  ;;  %v173_v3 = vadd.f32 %v872_v1, %v103_v53  ;;  %294 = vst [vmem:[%s1767_s3 + $0x40] sm:$0xff] %v230_v55  ;;  %v234_v7 = vmax.f32 %v170_v56, 0.0  ;;  %v104_v10 = vmul.f32 %v867_v0, %v34_v54  ;;  %v50_v56 = vld [vmem:[%s1764_s0 + $0x100] sm:$0xff] }
   0xf   :  { %v235_v8 = vmax.f32 %v171_v57, 0.0  ;;  %v236_v9 = vmax.f32 %v172_v58, 0.0  ;;  %295 = vst [vmem:[%s1767_s3 + $0x48] sm:$0xff] %v231_v62  ;;  %296 = vst [vmem:[%s1767_s3 + $0x50] sm:$0xff] %v232_v63  ;;  %v105_v13 = vmul.f32 %v867_v0, %v35_v59  ;;  %v106_v14 = vmul.f32 %v867_v0, %v36_v60  ;;  %v52_v62 = vld [vmem:[%s1764_s0 + $0x110] sm:$0xff]  ;;  %v53_v63 = vld [vmem:[%s1764_s0 + $0x118] sm:$0xff] }
  0x10   :  { %297 = vst [vmem:[%s1767_s3 + $0x58] sm:$0xff] %v233_v2  ;;  %v237_v12 = vmax.f32 %v173_v3, 0.0  ;;  %v107_v15 = vmul.f32 %v867_v0, %v37_v61  ;;  %298 = vst [vmem:[%s1767_s3 + $0x60] sm:$0xff] %v234_v7  ;;  %v174_v16 = vadd.f32 %v872_v1, %v104_v10  ;;  %v108_v17 = vmul.f32 %v867_v0, %v38_v4  ;;  %v51_v61 = vld [vmem:[%s1764_s0 + $0x108] sm:$0xff] }
  0x11   :  { %299 = vst [vmem:[%s1767_s3 + $0x68] sm:$0xff] %v235_v8  ;;  %300 = vst [vmem:[%s1767_s3 + $0x70] sm:$0xff] %v236_v9  ;;  %v109_v18 = vmul.f32 %v867_v0, %v39_v5  ;;  %v110_v19 = vmul.f32 %v867_v0, %v40_v6  ;;  %v175_v20 = vadd.f32 %v872_v1, %v105_v13  ;;  %v54_v6 = vld [vmem:[%s1764_s0 + $0x120] sm:$0xff]  ;;  %v55_v7 = vld [vmem:[%s1764_s0 + $0x128] sm:$0xff] }
  0x12   :  { %301 = vst [vmem:[%s1767_s3 + $0x78] sm:$0xff] %v237_v12  ;;  %v176_v21 = vadd.f32 %v872_v1, %v106_v14  ;;  %v177_v22 = vadd.f32 %v872_v1, %v107_v15  ;;  %v111_v23 = vmul.f32 %v867_v0, %v41_v11  ;;  %v238_v25 = vmax.f32 %v174_v16, 0.0  ;;  %v56_v8 = vld [vmem:[%s1764_s0 + $0x130] sm:$0xff]  ;;  %v57_v13 = vld [vmem:[%s1764_s0 + $0x138] sm:$0xff] }
  0x13   :  { %v178_v26 = vadd.f32 %v872_v1, %v108_v17  ;;  %v179_v27 = vadd.f32 %v872_v1, %v109_v18  ;;  %v180_v28 = vadd.f32 %v872_v1, %v110_v19  ;;  %v239_v32 = vmax.f32 %v175_v20, 0.0 }
  0x14   :  { %v240_v33 = vmax.f32 %v176_v21, 0.0  ;;  %v241_v34 = vmax.f32 %v177_v22, 0.0  ;;  %v181_v35 = vadd.f32 %v872_v1, %v111_v23  ;;  %302 = vst [vmem:[%s1767_s3 + $0x80] sm:$0xff] %v238_v25  ;;  %v112_v42 = vmul.f32 %v867_v0, %v42_v24 }
  0x15   :  { %v242_v39 = vmax.f32 %v178_v26, 0.0  ;;  %v243_v40 = vmax.f32 %v179_v27, 0.0  ;;  %v244_v41 = vmax.f32 %v180_v28, 0.0  ;;  %303 = vst [vmem:[%s1767_s3 + $0x88] sm:$0xff] %v239_v32  ;;  %v113_v45 = vmul.f32 %v867_v0, %v43_v29  ;;  %v58_v26 = vld [vmem:[%s1764_s0 + $0x140] sm:$0xff]  ;;  %v60_v32 = vld [vmem:[%s1764_s0 + $0x150] sm:$0xff] }
  0x16   :  { %304 = vst [vmem:[%s1767_s3 + $0x90] sm:$0xff] %v240_v33  ;;  %305 = vst [vmem:[%s1767_s3 + $0x98] sm:$0xff] %v241_v34  ;;  %v245_v44 = vmax.f32 %v181_v35, 0.0  ;;  %v114_v46 = vmul.f32 %v867_v0, %v44_v30  ;;  %v115_v47 = vmul.f32 %v867_v0, %v45_v31  ;;  %v182_v48 = vadd.f32 %v872_v1, %v112_v42  ;;  %v59_v31 = vld [vmem:[%s1764_s0 + $0x148] sm:$0xff]  ;;  %v61_v33 = vld [vmem:[%s1764_s0 + $0x158] sm:$0xff] }
  0x17   :  { %306 = vst [vmem:[%s1767_s3 + $0xa0] sm:$0xff] %v242_v39  ;;  %307 = vst [vmem:[%s1767_s3 + $0xa8] sm:$0xff] %v243_v40  ;;  %v116_v49 = vmul.f32 %v867_v0, %v46_v36  ;;  %v117_v50 = vmul.f32 %v867_v0, %v47_v37  ;;  %v118_v51 = vmul.f32 %v867_v0, %v48_v38  ;;  %v62_v38 = vld [vmem:[%s1764_s0 + $0x160] sm:$0xff]  ;;  %v63_v39 = vld [vmem:[%s1764_s0 + $0x168] sm:$0xff] }
  0x18   :  { %308 = vst [vmem:[%s1767_s3 + $0xb0] sm:$0xff] %v244_v41  ;;  %309 = vst [vmem:[%s1767_s3 + $0xb8] sm:$0xff] %v245_v44  ;;  %v183_v52 = vadd.f32 %v872_v1, %v113_v45  ;;  %v184_v53 = vadd.f32 %v872_v1, %v114_v46  ;;  %v185_v54 = vadd.f32 %v872_v1, %v115_v47  ;;  %v246_v57 = vmax.f32 %v182_v48, 0.0  ;;  %v64_v40 = vld [vmem:[%s1764_s0 + $0x170] sm:$0xff]  ;;  %v65_v45 = vld [vmem:[%s1764_s0 + $0x178] sm:$0xff] }
  0x19   :  { %v119_v55 = vmul.f32 %v867_v0, %v49_v43  ;;  %v186_v58 = vadd.f32 %v872_v1, %v116_v49  ;;  %v187_v59 = vadd.f32 %v872_v1, %v117_v50  ;;  %v188_v60 = vadd.f32 %v872_v1, %v118_v51 }
  0x1a   :  { %v247_v2 = vmax.f32 %v183_v52, 0.0  ;;  %v248_v3 = vmax.f32 %v184_v53, 0.0  ;;  %v249_v4 = vmax.f32 %v185_v54, 0.0  ;;  %310 = vst [vmem:[%s1767_s3 + $0xc0] sm:$0xff] %v246_v57  ;;  %v120_v12 = vmul.f32 %v867_v0, %v50_v56 }
  0x1b   :  { %v189_v5 = vadd.f32 %v872_v1, %v119_v55  ;;  %v250_v9 = vmax.f32 %v186_v58, 0.0  ;;  %v251_v10 = vmax.f32 %v187_v59, 0.0  ;;  %v252_v11 = vmax.f32 %v188_v60, 0.0  ;;  %v66_v58 = vld [vmem:[%s1764_s0 + $0x180] sm:$0xff] }
  0x1c   :  { %311 = vst [vmem:[%s1767_s3 + $0xc8] sm:$0xff] %v247_v2  ;;  %312 = vst [vmem:[%s1767_s3 + $0xd0] sm:$0xff] %v248_v3  ;;  %v121_v15 = vmul.f32 %v867_v0, %v51_v61  ;;  %v122_v16 = vmul.f32 %v867_v0, %v52_v62  ;;  %v123_v17 = vmul.f32 %v867_v0, %v53_v63  ;;  %v67_v63 = vld [vmem:[%s1764_s0 + $0x188] sm:$0xff]  ;;  %v68_v2 = vld [vmem:[%s1764_s0 + $0x190] sm:$0xff] }
  0x1d   :  { %313 = vst [vmem:[%s1767_s3 + $0xd8] sm:$0xff] %v249_v4  ;;  %v253_v14 = vmax.f32 %v189_v5, 0.0  ;;  %314 = vst [vmem:[%s1767_s3 + $0xe0] sm:$0xff] %v250_v9  ;;  %v190_v18 = vadd.f32 %v872_v1, %v120_v12  ;;  %v124_v19 = vmul.f32 %v867_v0, %v54_v6  ;;  %v125_v20 = vmul.f32 %v867_v0, %v55_v7  ;;  %v69_v3 = vld [vmem:[%s1764_s0 + $0x198] sm:$0xff]  ;;  %v71_v9 = vld [vmem:[%s1764_s0 + $0x1a8] sm:$0xff] }
  0x1e   :  { %315 = vst [vmem:[%s1767_s3 + $0xe8] sm:$0xff] %v251_v10  ;;  %316 = vst [vmem:[%s1767_s3 + $0xf0] sm:$0xff] %v252_v11  ;;  %v126_v21 = vmul.f32 %v867_v0, %v56_v8  ;;  %v191_v22 = vadd.f32 %v872_v1, %v121_v15  ;;  %v192_v23 = vadd.f32 %v872_v1, %v122_v16  ;;  %v70_v8 = vld [vmem:[%s1764_s0 + $0x1a0] sm:$0xff]  ;;  %v72_v10 = vld [vmem:[%s1764_s0 + $0x1b0] sm:$0xff] }
  0x1f   :  { %317 = vst [vmem:[%s1767_s3 + $0xf8] sm:$0xff] %v253_v14  ;;  %v193_v24 = vadd.f32 %v872_v1, %v123_v17  ;;  %v127_v25 = vmul.f32 %v867_v0, %v57_v13  ;;  %v254_v27 = vmax.f32 %v190_v18, 0.0  ;;  %v194_v28 = vadd.f32 %v872_v1, %v124_v19  ;;  %v73_v15 = vld [vmem:[%s1764_s0 + $0x1b8] sm:$0xff] }
  0x20   :  { %v195_v29 = vadd.f32 %v872_v1, %v125_v20  ;;  %v196_v30 = vadd.f32 %v872_v1, %v126_v21  ;;  %v255_v34 = vmax.f32 %v191_v22, 0.0  ;;  %v256_v35 = vmax.f32 %v192_v23, 0.0 }
  0x21   :  { %v257_v36 = vmax.f32 %v193_v24, 0.0  ;;  %v197_v37 = vadd.f32 %v872_v1, %v127_v25  ;;  %318 = vst [vmem:[%s1767_s3 + $0x100] sm:$0xff] %v254_v27  ;;  %v258_v41 = vmax.f32 %v194_v28, 0.0  ;;  %v128_v44 = vmul.f32 %v867_v0, %v58_v26  ;;  %v74_v28 = vld [vmem:[%s1764_s0 + $0x1c0] sm:$0xff] }
  0x22   :  { %v259_v42 = vmax.f32 %v195_v29, 0.0  ;;  %v260_v43 = vmax.f32 %v196_v30, 0.0  ;;  %319 = vst [vmem:[%s1767_s3 + $0x108] sm:$0xff] %v255_v34  ;;  %320 = vst [vmem:[%s1767_s3 + $0x110] sm:$0xff] %v256_v35  ;;  %v129_v47 = vmul.f32 %v867_v0, %v59_v31  ;;  %v130_v48 = vmul.f32 %v867_v0, %v60_v32  ;;  %v76_v34 = vld [vmem:[%s1764_s0 + $0x1d0] sm:$0xff]  ;;  %v77_v35 = vld [vmem:[%s1764_s0 + $0x1d8] sm:$0xff] }
  0x23   :  { %321 = vst [vmem:[%s1767_s3 + $0x118] sm:$0xff] %v257_v36  ;;  %v261_v46 = vmax.f32 %v197_v37, 0.0  ;;  %v131_v49 = vmul.f32 %v867_v0, %v61_v33  ;;  %322 = vst [vmem:[%s1767_s3 + $0x120] sm:$0xff] %v258_v41  ;;  %v198_v50 = vadd.f32 %v872_v1, %v128_v44  ;;  %v132_v51 = vmul.f32 %v867_v0, %v62_v38  ;;  %v75_v33 = vld [vmem:[%s1764_s0 + $0x1c8] sm:$0xff] }
  0x24   :  { %323 = vst [vmem:[%s1767_s3 + $0x128] sm:$0xff] %v259_v42  ;;  %324 = vst [vmem:[%s1767_s3 + $0x130] sm:$0xff] %v260_v43  ;;  %v133_v52 = vmul.f32 %v867_v0, %v63_v39  ;;  %v134_v53 = vmul.f32 %v867_v0, %v64_v40  ;;  %v199_v54 = vadd.f32 %v872_v1, %v129_v47  ;;  %v78_v40 = vld [vmem:[%s1764_s0 + $0x1e0] sm:$0xff]  ;;  %v79_v41 = vld [vmem:[%s1764_s0 + $0x1e8] sm:$0xff] }
  0x25   :  { %325 = vst [vmem:[%s1767_s3 + $0x138] sm:$0xff] %v261_v46  ;;  %v200_v55 = vadd.f32 %v872_v1, %v130_v48  ;;  %v201_v56 = vadd.f32 %v872_v1, %v131_v49  ;;  %v135_v57 = vmul.f32 %v867_v0, %v65_v45  ;;  %v262_v59 = vmax.f32 %v198_v50, 0.0  ;;  %v80_v42 = vld [vmem:[%s1764_s0 + $0x1f0] sm:$0xff]  ;;  %v81_v47 = vld [vmem:[%s1764_s0 + $0x1f8] sm:$0xff] }
  0x26   :  { %v202_v60 = vadd.f32 %v872_v1, %v132_v51  ;;  %v203_v61 = vadd.f32 %v872_v1, %v133_v52  ;;  %v204_v62 = vadd.f32 %v872_v1, %v134_v53  ;;  %v263_v4 = vmax.f32 %v199_v54, 0.0 }
  0x27   :  { %v264_v5 = vmax.f32 %v200_v55, 0.0  ;;  %v265_v6 = vmax.f32 %v201_v56, 0.0  ;;  %v205_v7 = vadd.f32 %v872_v1, %v135_v57  ;;  %326 = vst [vmem:[%s1767_s3 + $0x140] sm:$0xff] %v262_v59  ;;  %v136_v14 = vmul.f32 %v867_v0, %v66_v58  ;;  %v350_v56 = vld [vmem:[%s1764_s0] ss:$2 sm:$0xff] }
  0x28   :  { %v266_v11 = vmax.f32 %v202_v60, 0.0  ;;  %v267_v12 = vmax.f32 %v203_v61, 0.0  ;;  %v268_v13 = vmax.f32 %v204_v62, 0.0  ;;  %327 = vst [vmem:[%s1767_s3 + $0x148] sm:$0xff] %v263_v4  ;;  %v137_v17 = vmul.f32 %v867_v0, %v67_v63  ;;  %v789_v61 = vld [vmem:[%s1764_s0 + $0x1] ss:$2 sm:$0xff] }
  0x29   :  { %328 = vst [vmem:[%s1767_s3 + $0x150] sm:$0xff] %v264_v5  ;;  %329 = vst [vmem:[%s1767_s3 + $0x158] sm:$0xff] %v265_v6  ;;  %v269_v16 = vmax.f32 %v205_v7, 0.0  ;;  %v138_v18 = vmul.f32 %v867_v0, %v68_v2  ;;  %v139_v19 = vmul.f32 %v867_v0, %v69_v3  ;;  %v206_v20 = vadd.f32 %v872_v1, %v136_v14  ;;  %v805_v62 = vld [vmem:[%s1764_s0 + $0x10] ss:$2 sm:$0xff] }
  0x2a   :  { %330 = vst [vmem:[%s1767_s3 + $0x160] sm:$0xff] %v266_v11  ;;  %331 = vst [vmem:[%s1767_s3 + $0x168] sm:$0xff] %v267_v12  ;;  %v140_v21 = vmul.f32 %v867_v0, %v70_v8  ;;  %v141_v22 = vmul.f32 %v867_v0, %v71_v9  ;;  %v142_v23 = vmul.f32 %v867_v0, %v72_v10  ;;  %v821_v63 = vld [vmem:[%s1764_s0 + $0x11] ss:$2 sm:$0xff]  ;;  %v774_v6 = vld [vmem:[%s1764_s0 + $0x20] ss:$2 sm:$0xff] }
  0x2b   :  { %332 = vst [vmem:[%s1767_s3 + $0x170] sm:$0xff] %v268_v13  ;;  %333 = vst [vmem:[%s1767_s3 + $0x178] sm:$0xff] %v269_v16  ;;  %v207_v24 = vadd.f32 %v872_v1, %v137_v17  ;;  %v208_v25 = vadd.f32 %v872_v1, %v138_v18  ;;  %v209_v26 = vadd.f32 %v872_v1, %v139_v19  ;;  %v270_v29 = vmax.f32 %v206_v20, 0.0  ;;  %v790_v7 = vld [vmem:[%s1764_s0 + $0x21] ss:$2 sm:$0xff] }
  0x2c   :  { %v143_v27 = vmul.f32 %v867_v0, %v73_v15  ;;  %v210_v30 = vadd.f32 %v872_v1, %v140_v21  ;;  %v211_v31 = vadd.f32 %v872_v1, %v141_v22  ;;  %v212_v32 = vadd.f32 %v872_v1, %v142_v23  ;;  %v806_v12 = vld [vmem:[%s1764_s0 + $0x30] ss:$2 sm:$0xff]  ;;  %v822_v17 = vld [vmem:[%s1764_s0 + $0x31] ss:$2 sm:$0xff] }
  0x2d   :  { %v271_v36 = vmax.f32 %v207_v24, 0.0  ;;  %v272_v37 = vmax.f32 %v208_v25, 0.0  ;;  %v273_v38 = vmax.f32 %v209_v26, 0.0  ;;  %334 = vst [vmem:[%s1767_s3 + $0x180] sm:$0xff] %v270_v29  ;;  %v144_v46 = vmul.f32 %v867_v0, %v74_v28 }
  0x2e   :  { %v213_v39 = vadd.f32 %v872_v1, %v143_v27  ;;  %v274_v43 = vmax.f32 %v210_v30, 0.0  ;;  %v275_v44 = vmax.f32 %v211_v31, 0.0  ;;  %v276_v45 = vmax.f32 %v212_v32, 0.0  ;;  %v775_v30 = vld [vmem:[%s1764_s0 + $0x40] ss:$2 sm:$0xff] }
  0x2f   :  { %335 = vst [vmem:[%s1767_s3 + $0x188] sm:$0xff] %v271_v36  ;;  %336 = vst [vmem:[%s1767_s3 + $0x190] sm:$0xff] %v272_v37  ;;  %v145_v49 = vmul.f32 %v867_v0, %v75_v33  ;;  %v146_v50 = vmul.f32 %v867_v0, %v76_v34  ;;  %v147_v51 = vmul.f32 %v867_v0, %v77_v35  ;;  %v791_v35 = vld [vmem:[%s1764_s0 + $0x41] ss:$2 sm:$0xff]  ;;  %v807_v36 = vld [vmem:[%s1764_s0 + $0x50] ss:$2 sm:$0xff] }
  0x30   :  { %337 = vst [vmem:[%s1767_s3 + $0x198] sm:$0xff] %v273_v38  ;;  %v277_v48 = vmax.f32 %v213_v39, 0.0  ;;  %338 = vst [vmem:[%s1767_s3 + $0x1a0] sm:$0xff] %v274_v43  ;;  %v214_v52 = vadd.f32 %v872_v1, %v144_v46  ;;  %v148_v53 = vmul.f32 %v867_v0, %v78_v40  ;;  %v149_v54 = vmul.f32 %v867_v0, %v79_v41  ;;  %v823_v41 = vld [vmem:[%s1764_s0 + $0x51] ss:$2 sm:$0xff] }
  0x31   :  { %339 = vst [vmem:[%s1767_s3 + $0x1a8] sm:$0xff] %v275_v44  ;;  %340 = vst [vmem:[%s1767_s3 + $0x1b0] sm:$0xff] %v276_v45  ;;  %v150_v55 = vmul.f32 %v867_v0, %v80_v42  ;;  %v215_v57 = vadd.f32 %v872_v1, %v145_v49  ;;  %v216_v58 = vadd.f32 %v872_v1, %v146_v50  ;;  %v776_v46 = vld [vmem:[%s1764_s0 + $0x60] ss:$2 sm:$0xff] }
  0x32   :  { %341 = vst [vmem:[%s1767_s3 + $0x1b8] sm:$0xff] %v277_v48  ;;  %v217_v59 = vadd.f32 %v872_v1, %v147_v51  ;;  %v151_v60 = vmul.f32 %v867_v0, %v81_v47  ;;  %v278_v2 = vmax.f32 %v214_v52, 0.0  ;;  %v218_v3 = vadd.f32 %v872_v1, %v148_v53  ;;  %v792_v51 = vld [vmem:[%s1764_s0 + $0x61] ss:$2 sm:$0xff] }
  0x33   :  { %v219_v4 = vadd.f32 %v872_v1, %v149_v54  ;;  %v220_v5 = vadd.f32 %v872_v1, %v150_v55  ;;  %v279_v8 = vmax.f32 %v215_v57, 0.0  ;;  %v280_v9 = vmax.f32 %v216_v58, 0.0 }
  0x34   :  { %v281_v10 = vmax.f32 %v217_v59, 0.0  ;;  %v221_v11 = vadd.f32 %v872_v1, %v151_v60  ;;  %342 = vst [vmem:[%s1767_s3 + $0x1c0] sm:$0xff] %v278_v2  ;;  %v282_v13 = vmax.f32 %v218_v3, 0.0  ;;  %v381_v16 = vmul.f32 %v867_v0, %v350_v56  ;;  %v808_v56 = vld [vmem:[%s1764_s0 + $0x70] ss:$2 sm:$0xff] }
  0x35   :  { %v283_v14 = vmax.f32 %v219_v4, 0.0  ;;  %v284_v15 = vmax.f32 %v220_v5, 0.0  ;;  %343 = vst [vmem:[%s1767_s3 + $0x1c8] sm:$0xff] %v279_v8  ;;  %344 = vst [vmem:[%s1767_s3 + $0x1d0] sm:$0xff] %v280_v9  ;;  %v461_v19 = vmul.f32 %v789_v61, %v867_v0  ;;  %v541_v20 = vmul.f32 %v805_v62, %v867_v0  ;;  %v824_v61 = vld [vmem:[%s1764_s0 + $0x71] ss:$2 sm:$0xff] }
  0x36   :  { %345 = vst [vmem:[%s1767_s3 + $0x1d8] sm:$0xff] %v281_v10  ;;  %v285_v18 = vmax.f32 %v221_v11, 0.0  ;;  %v621_v21 = vmul.f32 %v821_v63, %v867_v0  ;;  %346 = vst [vmem:[%s1767_s3 + $0x1e0] sm:$0xff] %v282_v13  ;;  %v397_v22 = vadd.f32 %v872_v1, %v381_v16  ;;  %v382_v23 = vmul.f32 %v774_v6, %v867_v0  ;;  %v777_v4 = vld [vmem:[%s1764_s0 + $0x80] ss:$2 sm:$0xff] }
  0x37   :  { %347 = vst [vmem:[%s1767_s3 + $0x1e8] sm:$0xff] %v283_v14  ;;  %348 = vst [vmem:[%s1767_s3 + $0x1f0] sm:$0xff] %v284_v15  ;;  %v462_v24 = vmul.f32 %v790_v7, %v867_v0  ;;  %v542_v25 = vmul.f32 %v806_v12, %v867_v0  ;;  %v477_v26 = vadd.f32 %v872_v1, %v461_v19  ;;  %v793_v9 = vld [vmem:[%s1764_s0 + $0x81] ss:$2 sm:$0xff]  ;;  %v809_v14 = vld [vmem:[%s1764_s0 + $0x90] ss:$2 sm:$0xff] }
  0x38   :  { %349 = vst [vmem:[%s1767_s3 + $0x1f8] sm:$0xff] %v285_v18  ;;  %v557_v27 = vadd.f32 %v872_v1, %v541_v20  ;;  %v637_v28 = vadd.f32 %v872_v1, %v621_v21  ;;  %v622_v29 = vmul.f32 %v822_v17, %v867_v0  ;;  %v413_v31 = vmax.f32 %v397_v22, 0.0  ;;  %v825_v15 = vld [vmem:[%s1764_s0 + $0x91] ss:$2 sm:$0xff] }
  0x39   :  { %v398_v32 = vadd.f32 %v872_v1, %v382_v23  ;;  %v478_v33 = vadd.f32 %v872_v1, %v462_v24  ;;  %v558_v34 = vadd.f32 %v872_v1, %v542_v25  ;;  %v493_v37 = vmax.f32 %v477_v26, 0.0  ;;  %v778_v24 = vld [vmem:[%s1764_s0 + $0xa0] ss:$2 sm:$0xff] }
  0x3a   :  { %v573_v38 = vmax.f32 %v557_v27, 0.0  ;;  %v653_v39 = vmax.f32 %v637_v28, 0.0  ;;  %v638_v40 = vadd.f32 %v872_v1, %v622_v29  ;;  %v383_v45 = vmul.f32 %v775_v30, %v867_v0  ;;  %v794_v29 = vld [vmem:[%s1764_s0 + $0xa1] ss:$2 sm:$0xff]  ;;  %v810_v30 = vld [vmem:[%s1764_s0 + $0xb0] ss:$2 sm:$0xff] }
  0x3b   :  { %v414_v42 = vmax.f32 %v398_v32, 0.0  ;;  %v494_v43 = vmax.f32 %v478_v33, 0.0  ;;  %v574_v44 = vmax.f32 %v558_v34, 0.0  ;;  %v669_v47 = vmax.f32 %v413_v31, %v493_v37 }
  0x3c   :  { %v685_v48 = vmax.f32 %v573_v38, %v653_v39  ;;  %v654_v49 = vmax.f32 %v638_v40, 0.0  ;;  %v463_v50 = vmul.f32 %v791_v35, %v867_v0  ;;  %v399_v53 = vadd.f32 %v872_v1, %v383_v45  ;;  %v826_v35 = vld [vmem:[%s1764_s0 + $0xb1] ss:$2 sm:$0xff] }
  0x3d   :  { %v670_v52 = vmax.f32 %v414_v42, %v494_v43  ;;  %v543_v54 = vmul.f32 %v807_v36, %v867_v0  ;;  %v623_v55 = vmul.f32 %v823_v41, %v867_v0  ;;  %v384_v60 = vmul.f32 %v776_v46, %v867_v0 }
  0x3e   :  { %v701_v57 = vmax.f32 %v669_v47, %v685_v48  ;;  %v686_v58 = vmax.f32 %v574_v44, %v654_v49  ;;  %v479_v59 = vadd.f32 %v872_v1, %v463_v50  ;;  %v415_v62 = vmax.f32 %v399_v53, 0.0  ;;  %v779_v44 = vld [vmem:[%s1764_s0 + $0xc0] ss:$2 sm:$0xff]  ;;  %v795_v49 = vld [vmem:[%s1764_s0 + $0xc1] ss:$2 sm:$0xff] }
  0x3f   :  { %v559_v63 = vadd.f32 %v872_v1, %v543_v54  ;;  %v639_v2 = vadd.f32 %v872_v1, %v623_v55  ;;  %v464_v3 = vmul.f32 %v792_v51, %v867_v0  ;;  %v400_v7 = vadd.f32 %v872_v1, %v384_v60  ;;  %v811_v50 = vld [vmem:[%s1764_s0 + $0xd0] ss:$2 sm:$0xff]  ;;  %v827_v55 = vld [vmem:[%s1764_s0 + $0xd1] ss:$2 sm:$0xff]  ;;  %v780_v60 = vld [vmem:[%s1764_s0 + $0xe0] ss:$2 sm:$0xff] }
  0x40   :  { %717 = vst [vmem:[%s1768_s4] sm:$0xff] %v701_v57  ;;  %v702_v5 = vmax.f32 %v670_v52, %v686_v58  ;;  %v495_v6 = vmax.f32 %v479_v59, 0.0  ;;  %v544_v8 = vmul.f32 %v808_v56, %v867_v0  ;;  %v624_v13 = vmul.f32 %v824_v61, %v867_v0 }
  0x41   :  { %v575_v10 = vmax.f32 %v559_v63, 0.0  ;;  %v655_v11 = vmax.f32 %v639_v2, 0.0  ;;  %v480_v12 = vadd.f32 %v872_v1, %v464_v3  ;;  %v416_v17 = vmax.f32 %v400_v7, 0.0  ;;  %v796_v3 = vld [vmem:[%s1764_s0 + $0xe1] ss:$2 sm:$0xff] }
  0x42   :  { %718 = vst [vmem:[%s1768_s4 + $0x8] sm:$0xff] %v702_v5  ;;  %v671_v16 = vmax.f32 %v415_v62, %v495_v6  ;;  %v560_v18 = vadd.f32 %v872_v1, %v544_v8  ;;  %v385_v19 = vmul.f32 %v777_v4, %v867_v0  ;;  %v640_v22 = vadd.f32 %v872_v1, %v624_v13  ;;  %v812_v8 = vld [vmem:[%s1764_s0 + $0xf0] ss:$2 sm:$0xff]  ;;  %v828_v13 = vld [vmem:[%s1764_s0 + $0xf1] ss:$2 sm:$0xff] }
  0x43   :  { %v687_v20 = vmax.f32 %v575_v10, %v655_v11  ;;  %v496_v21 = vmax.f32 %v480_v12, 0.0  ;;  %v465_v23 = vmul.f32 %v793_v9, %v867_v0  ;;  %v545_v27 = vmul.f32 %v809_v14, %v867_v0 }
  0x44   :  { %v576_v25 = vmax.f32 %v560_v18, 0.0  ;;  %v401_v26 = vadd.f32 %v872_v1, %v385_v19  ;;  %v625_v28 = vmul.f32 %v825_v15, %v867_v0  ;;  %v656_v32 = vmax.f32 %v640_v22, 0.0  ;;  %v781_v18 = vld [vmem:[%s1764_s0 + $0x100] ss:$2 sm:$0xff] }
  0x45   :  { %v703_v31 = vmax.f32 %v671_v16, %v687_v20  ;;  %v672_v33 = vmax.f32 %v416_v17, %v496_v21  ;;  %v481_v34 = vadd.f32 %v872_v1, %v465_v23  ;;  %v561_v37 = vadd.f32 %v872_v1, %v545_v27  ;;  %v797_v23 = vld [vmem:[%s1764_s0 + $0x101] ss:$2 sm:$0xff] }
  0x46   :  { %v417_v36 = vmax.f32 %v401_v26, 0.0  ;;  %v641_v38 = vadd.f32 %v872_v1, %v625_v28  ;;  %v386_v39 = vmul.f32 %v778_v24, %v867_v0  ;;  %v688_v40 = vmax.f32 %v576_v25, %v656_v32  ;;  %v813_v28 = vld [vmem:[%s1764_s0 + $0x110] ss:$2 sm:$0xff] }
  0x47   :  { %719 = vst [vmem:[%s1768_s4 + $0x10] sm:$0xff] %v703_v31  ;;  %v497_v41 = vmax.f32 %v481_v34, 0.0  ;;  %v466_v42 = vmul.f32 %v794_v29, %v867_v0  ;;  %v546_v43 = vmul.f32 %v810_v30, %v867_v0  ;;  %v577_v45 = vmax.f32 %v561_v37, 0.0  ;;  %v829_v29 = vld [vmem:[%s1764_s0 + $0x111] ss:$2 sm:$0xff] }
  0x48   :  { %v657_v46 = vmax.f32 %v641_v38, 0.0  ;;  %v402_v47 = vadd.f32 %v872_v1, %v386_v39  ;;  %v626_v48 = vmul.f32 %v826_v35, %v867_v0  ;;  %v704_v51 = vmax.f32 %v672_v33, %v688_v40  ;;  %v782_v38 = vld [vmem:[%s1764_s0 + $0x120] ss:$2 sm:$0xff] }
  0x49   :  { %v673_v52 = vmax.f32 %v417_v36, %v497_v41  ;;  %v482_v53 = vadd.f32 %v872_v1, %v466_v42  ;;  %v562_v54 = vadd.f32 %v872_v1, %v546_v43  ;;  %v387_v59 = vmul.f32 %v779_v44, %v867_v0  ;;  %v798_v43 = vld [vmem:[%s1764_s0 + $0x121] ss:$2 sm:$0xff]  ;;  %v814_v44 = vld [vmem:[%s1764_s0 + $0x130] ss:$2 sm:$0xff] }
  0x4a   :  { %v689_v56 = vmax.f32 %v577_v45, %v657_v46  ;;  %v418_v57 = vmax.f32 %v402_v47, 0.0  ;;  %v642_v58 = vadd.f32 %v872_v1, %v626_v48  ;;  %720 = vst [vmem:[%s1768_s4 + $0x18] sm:$0xff] %v704_v51  ;;  %v467_v63 = vmul.f32 %v795_v49, %v867_v0  ;;  %v830_v49 = vld [vmem:[%s1764_s0 + $0x131] ss:$2 sm:$0xff] }
  0x4b   :  { %v498_v61 = vmax.f32 %v482_v53, 0.0  ;;  %v578_v62 = vmax.f32 %v562_v54, 0.0  ;;  %v547_v2 = vmul.f32 %v811_v50, %v867_v0  ;;  %v403_v6 = vadd.f32 %v872_v1, %v387_v59 }
  0x4c   :  { %v705_v4 = vmax.f32 %v673_v52, %v689_v56  ;;  %v658_v5 = vmax.f32 %v642_v58, 0.0  ;;  %v627_v7 = vmul.f32 %v827_v55, %v867_v0  ;;  %v483_v10 = vadd.f32 %v872_v1, %v467_v63  ;;  %v783_v58 = vld [vmem:[%s1764_s0 + $0x140] ss:$2 sm:$0xff]  ;;  %v799_v63 = vld [vmem:[%s1764_s0 + $0x141] ss:$2 sm:$0xff] }
  0x4d   :  { %v674_v9 = vmax.f32 %v418_v57, %v498_v61  ;;  %v563_v11 = vadd.f32 %v872_v1, %v547_v2  ;;  %v388_v12 = vmul.f32 %v780_v60, %v867_v0  ;;  %v419_v15 = vmax.f32 %v403_v6, 0.0  ;;  %v815_v2 = vld [vmem:[%s1764_s0 + $0x150] ss:$2 sm:$0xff]  ;;  %v1617_v6 = vld [vmem:[%s1766_s2] ss:$0 sm:$0xff] }
  0x4e   :  { %721 = vst [vmem:[%s1768_s4 + $0x20] sm:$0xff] %v705_v4  ;;  %v690_v14 = vmax.f32 %v578_v62, %v658_v5  ;;  %v643_v16 = vadd.f32 %v872_v1, %v627_v7  ;;  %v468_v17 = vmul.f32 %v796_v3, %v867_v0  ;;  %v499_v19 = vmax.f32 %v483_v10, 0.0 }
  0x4f   :  { %v579_v20 = vmax.f32 %v563_v11, 0.0  ;;  %v404_v21 = vadd.f32 %v872_v1, %v388_v12  ;;  %v548_v22 = vmul.f32 %v812_v8, %v867_v0  ;;  %v628_v27 = vmul.f32 %v828_v13, %v867_v0  ;;  %v1627_v11 = vld [vmem:[%s1765_s1] ss:$0 sm:$0xff] }
  0x50   :  { %v706_v24 = vmax.f32 %v674_v9, %v690_v14  ;;  %v659_v25 = vmax.f32 %v643_v16, 0.0  ;;  %v484_v26 = vadd.f32 %v872_v1, %v468_v17  ;;  %v675_v30 = vmax.f32 %v419_v15, %v499_v19  ;;  %v784_v12 = vld [vmem:[%s1764_s0 + $0x160] ss:$2 sm:$0xff]  ;;  %v800_v17 = vld [vmem:[%s1764_s0 + $0x161] ss:$2 sm:$0xff] }
  0x51   :  { %v420_v31 = vmax.f32 %v404_v21, 0.0  ;;  %v564_v32 = vadd.f32 %v872_v1, %v548_v22  ;;  %v389_v33 = vmul.f32 %v781_v18, %v867_v0  ;;  %v644_v36 = vadd.f32 %v872_v1, %v628_v27  ;;  %v816_v22 = vld [vmem:[%s1764_s0 + $0x170] ss:$2 sm:$0xff]  ;;  %v832_v27 = vld [vmem:[%s1764_s0 + $0x171] ss:$2 sm:$0xff] }
  0x52   :  { %722 = vst [vmem:[%s1768_s4 + $0x28] sm:$0xff] %v706_v24  ;;  %v691_v34 = vmax.f32 %v579_v20, %v659_v25  ;;  %v500_v35 = vmax.f32 %v484_v26, 0.0  ;;  %v469_v37 = vmul.f32 %v797_v23, %v867_v0  ;;  %v549_v41 = vmul.f32 %v813_v28, %v867_v0 }
  0x53   :  { %v580_v39 = vmax.f32 %v564_v32, 0.0  ;;  %v405_v40 = vadd.f32 %v872_v1, %v389_v33  ;;  %v629_v42 = vmul.f32 %v829_v29, %v867_v0  ;;  %v660_v46 = vmax.f32 %v644_v36, 0.0  ;;  %v785_v32 = vld [vmem:[%s1764_s0 + $0x180] ss:$2 sm:$0xff] }
  0x54   :  { %v707_v45 = vmax.f32 %v675_v30, %v691_v34  ;;  %v676_v47 = vmax.f32 %v420_v31, %v500_v35  ;;  %v485_v48 = vadd.f32 %v872_v1, %v469_v37  ;;  %v565_v51 = vadd.f32 %v872_v1, %v549_v41  ;;  %v801_v37 = vld [vmem:[%s1764_s0 + $0x181] ss:$2 sm:$0xff] }
  0x55   :  { %v421_v50 = vmax.f32 %v405_v40, 0.0  ;;  %v645_v52 = vadd.f32 %v872_v1, %v629_v42  ;;  %v390_v53 = vmul.f32 %v782_v38, %v867_v0  ;;  %v692_v54 = vmax.f32 %v580_v39, %v660_v46  ;;  %v817_v42 = vld [vmem:[%s1764_s0 + $0x190] ss:$2 sm:$0xff] }
  0x56   :  { %723 = vst [vmem:[%s1768_s4 + $0x30] sm:$0xff] %v707_v45  ;;  %v501_v55 = vmax.f32 %v485_v48, 0.0  ;;  %v470_v56 = vmul.f32 %v798_v43, %v867_v0  ;;  %v550_v57 = vmul.f32 %v814_v44, %v867_v0  ;;  %v581_v59 = vmax.f32 %v565_v51, 0.0  ;;  %v833_v43 = vld [vmem:[%s1764_s0 + $0x191] ss:$2 sm:$0xff] }
  0x57   :  { %v661_v60 = vmax.f32 %v645_v52, 0.0  ;;  %v406_v61 = vadd.f32 %v872_v1, %v390_v53  ;;  %v630_v62 = vmul.f32 %v830_v49, %v867_v0  ;;  %v708_v3 = vmax.f32 %v676_v47, %v692_v54  ;;  %v831_v0 = vld [vmem:[%s1764_s0 + $0x151] ss:$2 sm:$0xff]  ;;  %v786_v52 = vld [vmem:[%s1764_s0 + $0x1a0] ss:$2 sm:$0xff] }
  0x58   :  { %v677_v4 = vmax.f32 %v421_v50, %v501_v55  ;;  %v486_v5 = vadd.f32 %v872_v1, %v470_v56  ;;  %v566_v7 = vadd.f32 %v1617_v6, %v550_v57  ;;  %v391_v1 = vmul.f32 %v1627_v11, %v783_v58  ;;  %v802_v57 = vld [vmem:[%s1764_s0 + $0x1a1] ss:$2 sm:$0xff]  ;;  %v818_v58 = vld [vmem:[%s1764_s0 + $0x1b0] ss:$2 sm:$0xff] }
  0x59   :  { %v693_v8 = vmax.f32 %v581_v59, %v661_v60  ;;  %v422_v9 = vmax.f32 %v406_v61, 0.0  ;;  %v646_v10 = vadd.f32 %v1617_v6, %v630_v62  ;;  %724 = vst [vmem:[%s1768_s4 + $0x38] sm:$0xff] %v708_v3  ;;  %v471_v15 = vmul.f32 %v1627_v11, %v799_v63  ;;  %v834_v63 = vld [vmem:[%s1764_s0 + $0x1b1] ss:$2 sm:$0xff] }
  0x5a   :  { %v502_v13 = vmax.f32 %v486_v5, 0.0  ;;  %v582_v14 = vmax.f32 %v566_v7, 0.0  ;;  %v551_v16 = vmul.f32 %v1627_v11, %v815_v2  ;;  %v407_v20 = vadd.f32 %v1617_v6, %v391_v1 }
  0x5b   :  { %v709_v18 = vmax.f32 %v677_v4, %v693_v8  ;;  %v662_v19 = vmax.f32 %v646_v10, 0.0  ;;  %v631_v21 = vmul.f32 %v1627_v11, %v831_v0  ;;  %v487_v24 = vadd.f32 %v1617_v6, %v471_v15  ;;  %v787_v10 = vld [vmem:[%s1764_s0 + $0x1c0] ss:$2 sm:$0xff]  ;;  %v803_v15 = vld [vmem:[%s1764_s0 + $0x1c1] ss:$2 sm:$0xff] }
  0x5c   :  { %v678_v23 = vmax.f32 %v422_v9, %v502_v13  ;;  %v567_v25 = vadd.f32 %v1617_v6, %v551_v16  ;;  %v392_v26 = vmul.f32 %v1627_v11, %v784_v12  ;;  %v423_v29 = vmax.f32 %v407_v20, 0.0  ;;  %v819_v16 = vld [vmem:[%s1764_s0 + $0x1d0] ss:$2 sm:$0xff] }
  0x5d   :  { %725 = vst [vmem:[%s1768_s4 + $0x40] sm:$0xff] %v709_v18  ;;  %v694_v28 = vmax.f32 %v582_v14, %v662_v19  ;;  %v647_v30 = vadd.f32 %v1617_v6, %v631_v21  ;;  %v472_v31 = vmul.f32 %v1627_v11, %v800_v17  ;;  %v503_v33 = vmax.f32 %v487_v24, 0.0  ;;  %v835_v21 = vld [vmem:[%s1764_s0 + $0x1d1] ss:$2 sm:$0xff] }
  0x5e   :  { %v583_v34 = vmax.f32 %v567_v25, 0.0  ;;  %v408_v35 = vadd.f32 %v1617_v6, %v392_v26  ;;  %v552_v36 = vmul.f32 %v1627_v11, %v816_v22  ;;  %v632_v41 = vmul.f32 %v1627_v11, %v832_v27  ;;  %v788_v26 = vld [vmem:[%s1764_s0 + $0x1e0] ss:$2 sm:$0xff] }
  0x5f   :  { %v710_v38 = vmax.f32 %v678_v23, %v694_v28  ;;  %v663_v39 = vmax.f32 %v647_v30, 0.0  ;;  %v488_v40 = vadd.f32 %v1617_v6, %v472_v31  ;;  %v679_v44 = vmax.f32 %v423_v29, %v503_v33  ;;  %v804_v31 = vld [vmem:[%s1764_s0 + $0x1e1] ss:$2 sm:$0xff] }
  0x60   :  { %v424_v45 = vmax.f32 %v408_v35, 0.0  ;;  %v568_v46 = vadd.f32 %v1617_v6, %v552_v36  ;;  %v393_v47 = vmul.f32 %v1627_v11, %v785_v32  ;;  %v648_v50 = vadd.f32 %v1617_v6, %v632_v41  ;;  %v820_v36 = vld [vmem:[%s1764_s0 + $0x1f0] ss:$2 sm:$0xff]  ;;  %v836_v41 = vld [vmem:[%s1764_s0 + $0x1f1] ss:$2 sm:$0xff] }
  0x61   :  { %726 = vst [vmem:[%s1768_s4 + $0x48] sm:$0xff] %v710_v38  ;;  %v695_v48 = vmax.f32 %v583_v34, %v663_v39  ;;  %v504_v49 = vmax.f32 %v488_v40, 0.0  ;;  %v473_v51 = vmul.f32 %v1627_v11, %v801_v37  ;;  %v553_v55 = vmul.f32 %v1627_v11, %v817_v42 }
  0x62   :  { %v584_v53 = vmax.f32 %v568_v46, 0.0  ;;  %v409_v54 = vadd.f32 %v1617_v6, %v393_v47  ;;  %v633_v56 = vmul.f32 %v1627_v11, %v833_v43  ;;  %v664_v60 = vmax.f32 %v648_v50, 0.0 }
  0x63   :  { %v711_v59 = vmax.f32 %v679_v44, %v695_v48  ;;  %v680_v61 = vmax.f32 %v424_v45, %v504_v49  ;;  %v489_v62 = vadd.f32 %v1617_v6, %v473_v51  ;;  %v569_v3 = vadd.f32 %v1617_v6, %v553_v55 }
  0x64   :  { %v425_v2 = vmax.f32 %v409_v54, 0.0  ;;  %v649_v4 = vadd.f32 %v1617_v6, %v633_v56  ;;  %v394_v5 = vmul.f32 %v1627_v11, %v786_v52  ;;  %v696_v7 = vmax.f32 %v584_v53, %v664_v60 }
  0x65   :  { %727 = vst [vmem:[%s1768_s4 + $0x50] sm:$0xff] %v711_v59  ;;  %v505_v0 = vmax.f32 %v489_v62, 0.0  ;;  %v474_v8 = vmul.f32 %v1627_v11, %v802_v57  ;;  %v554_v9 = vmul.f32 %v1627_v11, %v818_v58  ;;  %v585_v1 = vmax.f32 %v569_v3, 0.0 }
  0x66   :  { %v665_v12 = vmax.f32 %v649_v4, 0.0  ;;  %v410_v13 = vadd.f32 %v1617_v6, %v394_v5  ;;  %v634_v14 = vmul.f32 %v1627_v11, %v834_v63  ;;  %v712_v17 = vmax.f32 %v680_v61, %v696_v7 }
  0x67   :  { %v681_v18 = vmax.f32 %v425_v2, %v505_v0  ;;  %v490_v19 = vadd.f32 %v1617_v6, %v474_v8  ;;  %v570_v20 = vadd.f32 %v1617_v6, %v554_v9  ;;  %v395_v25 = vmul.f32 %v1627_v11, %v787_v10 }
  0x68   :  { %v697_v22 = vmax.f32 %v585_v1, %v665_v12  ;;  %v426_v23 = vmax.f32 %v410_v13, 0.0  ;;  %v650_v24 = vadd.f32 %v1617_v6, %v634_v14  ;;  %728 = vst [vmem:[%s1768_s4 + $0x58] sm:$0xff] %v712_v17  ;;  %v475_v29 = vmul.f32 %v1627_v11, %v803_v15 }
  0x69   :  { %v506_v27 = vmax.f32 %v490_v19, 0.0  ;;  %v586_v28 = vmax.f32 %v570_v20, 0.0  ;;  %v555_v30 = vmul.f32 %v1627_v11, %v819_v16  ;;  %v411_v34 = vadd.f32 %v1617_v6, %v395_v25 }
  0x6a   :  { %v713_v32 = vmax.f32 %v681_v18, %v697_v22  ;;  %v666_v33 = vmax.f32 %v650_v24, 0.0  ;;  %v635_v35 = vmul.f32 %v1627_v11, %v835_v21  ;;  %v491_v38 = vadd.f32 %v1617_v6, %v475_v29 }
  0x6b   :  { %v682_v37 = vmax.f32 %v426_v23, %v506_v27  ;;  %v571_v39 = vadd.f32 %v1617_v6, %v555_v30  ;;  %v396_v40 = vmul.f32 %v1627_v11, %v788_v26  ;;  %v427_v43 = vmax.f32 %v411_v34, 0.0 }
  0x6c   :  { %729 = vst [vmem:[%s1768_s4 + $0x60] sm:$0xff] %v713_v32  ;;  %v698_v42 = vmax.f32 %v586_v28, %v666_v33  ;;  %v651_v44 = vadd.f32 %v1617_v6, %v635_v35  ;;  %v476_v45 = vmul.f32 %v1627_v11, %v804_v31  ;;  %v507_v46 = vmax.f32 %v491_v38, 0.0 }
  0x6d   :  { %v587_v47 = vmax.f32 %v571_v39, 0.0  ;;  %v412_v48 = vadd.f32 %v1617_v6, %v396_v40  ;;  %v556_v49 = vmul.f32 %v1627_v11, %v820_v36  ;;  %v636_v53 = vmul.f32 %v1627_v11, %v836_v41 }
  0x6e   :  { %v714_v50 = vmax.f32 %v682_v37, %v698_v42  ;;  %v667_v51 = vmax.f32 %v651_v44, 0.0  ;;  %v492_v52 = vadd.f32 %v1617_v6, %v476_v45  ;;  %v683_v54 = vmax.f32 %v427_v43, %v507_v46 }
  0x6f   :  { %v428_v55 = vmax.f32 %v412_v48, 0.0  ;;  %v572_v56 = vadd.f32 %v1617_v6, %v556_v49  ;;  %v652_v59 = vadd.f32 %v1617_v6, %v636_v53 }
  0x70   :  { %730 = vst [vmem:[%s1768_s4 + $0x68] sm:$0xff] %v714_v50  ;;  %v699_v57 = vmax.f32 %v587_v47, %v667_v51  ;;  %v508_v58 = vmax.f32 %v492_v52, 0.0 }
  0x71   :  { %v588_v60 = vmax.f32 %v572_v56, 0.0  ;;  %v668_v62 = vmax.f32 %v652_v59, 0.0 }
  0x72   :  { %v715_v61 = vmax.f32 %v683_v54, %v699_v57  ;;  %v684_v63 = vmax.f32 %v428_v55, %v508_v58 }
  0x73   :  { %v700_v11 = vmax.f32 %v588_v60, %v668_v62 }
  0x74   :  { %731 = vst [vmem:[%s1768_s4 + $0x70] sm:$0xff] %v715_v61 }
  0x75   :  { %v716_v2 = vmax.f32 %v684_v63, %v700_v11 }
  0x77   :  { %732 = vst [vmem:[%s1768_s4 + $0x78] sm:$0xff] %v716_v2 }

</bundles_post_ra>
